<compile_context>
chip_gen: v6e
topology: v6e:2x2x1
jax: 0.10.0
libtpu: 0.0.40
codegen_flags: <defaults>
</compile_context>

<pallas_src>
import functools

import jax
import jax.numpy as jnp
from jax.experimental import pallas as pl
from jax.experimental.pallas import tpu as pltpu


_VMEM_LIMIT = 32 * 1024 * 1024  # explicit scoped-VMEM budget, safe on v5e/v6e/v7x


def _batch_tiling(batch):
    """Pick a batch tile (multiple of 8 for f32 sublane alignment) and a padded
    batch so the parallel grid always has >=2 steps (v7x: both TCs busy)."""
    if batch > 32:
        tile = 32
    elif batch > 16:
        tile = 16
    else:
        tile = 8
    padded = max(2 * tile, ((batch + tile - 1) // tile) * tile)
    return padded, tile


# ----------------------------------------------------------------------------
# Fused kernel: conv1 -> conv2 -> conv3 -> fc1 -> fc2 -> fc3 -> softmax
# ----------------------------------------------------------------------------
def _mynetwork_kernel(x_ref, cw1, cb1, cw2, cb2, cw3, cb3,
                      fw1, fb1, fw2, fb2, fw3, fb3, o_ref):
    # x_ref: [H, tile_b, lane_in]  (one slab per input image row, batch on the
    #        sublane dim, (w, c) flattened + zero-padded on the lane dim)
    h_in, tb, _ = x_ref.shape

    def conv_layer(rows, w_ref, b_ref):
        # rows: list (len = 2*n_out) of [tb, lane] f32 slabs, one per input
        # image row, vectorized over the tb images of this batch tile.
        n_out = len(rows) // 2
        zero = jnp.zeros_like(rows[0])                 # top padding row
        slabs = []
        for h in range(n_out):                         # stride-2 row window
            top = rows[2 * h - 1] if h > 0 else zero
            slabs.append(jnp.concatenate([top, rows[2 * h], rows[2 * h + 1]],
                                         axis=-1))     # [tb, 3*lane]
        patches = jnp.concatenate(slabs, axis=0).astype(jnp.bfloat16)
        acc = jnp.dot(patches, w_ref[...], preferred_element_type=jnp.float32)
        act = jnp.maximum(acc + b_ref[...], 0.0)       # [n_out*tb, lane_out]
        return [act[h * tb:(h + 1) * tb] for h in range(n_out)]

    rows = [x_ref[r] for r in range(h_in)]             # conv1 input rows (f32)
    rows = conv_layer(rows, cw1, cb1)                  # [16 x (tb, 128)]
    rows = conv_layer(rows, cw2, cb2)                  # [ 8 x (tb, 128)]
    rows = conv_layer(rows, cw3, cb3)                  # [ 4 x (tb, 128)]

    # per-image flatten, columns ordered (h, w, c); fc1 rows are pre-permuted.
    xf = jnp.concatenate(rows, axis=-1).astype(jnp.bfloat16)      # [tb, 512]
    h1 = jnp.dot(xf, fw1[...], preferred_element_type=jnp.float32)
    h1 = jnp.maximum(h1 + fb1[...], 0.0)
    h2 = jnp.dot(h1.astype(jnp.bfloat16), fw2[...],
                 preferred_element_type=jnp.float32)
    h2 = jnp.maximum(h2 + fb2[...], 0.0)
    logits = jnp.dot(h2.astype(jnp.bfloat16), fw3[...],
                     preferred_element_type=jnp.float32) + fb3[...]
    # exact softmax (pad classes carry bias=-1e30 -> exp underflows to 0)
    m = jnp.max(logits, axis=-1, keepdims=True)
    e = jnp.exp(logits - m)
    o_ref[...] = (e / jnp.sum(e, axis=-1, keepdims=True)).astype(o_ref.dtype)


# ----------------------------------------------------------------------------
# One-time weight preprocessing (hoisted out of the jitted forward)
# ----------------------------------------------------------------------------
def _fold_conv_weight(w_oihw, wi_len, lane_in, scale=1.0):
    """[Cout,Cin,3,3] (torch OIHW) -> [3*lane_in, (wi_len//2)*Cout] matrix that
    maps a concatenated 3-row slab (each row = previous-layer activation row,
    layout wi-major/ci-minor, zero-padded to lane_in) to one output image row
    (wo-major/co-minor).  Encodes the stride-2 / pad-1 horizontal taps."""
    cout, cin = int(w_oihw.shape[0]), int(w_oihw.shape[1])
    wo_len = wi_len // 2
    wi = jnp.arange(wi_len)
    wo = jnp.arange(wo_len)
    j = wi[None, :] - 2 * wo[:, None] + 1                     # [wo, wi] tap idx
    valid = ((j >= 0) & (j < 3)).astype(w_oihw.dtype)
    jc = jnp.clip(j, 0, 2)
    w_rjio = jnp.transpose(w_oihw, (2, 3, 1, 0))              # [r, j, ci, co]
    taps = jnp.take(w_rjio, jc, axis=1)                       # [r, wo, wi, ci, co]
    taps = taps * valid[None, :, :, None, None] * scale
    taps = jnp.transpose(taps, (0, 2, 3, 1, 4))               # [r, wi, ci, wo, co]
    mat = taps.reshape(3, wi_len * cin, wo_len * cout)
    if wi_len * cin < lane_in:                                # lane zero-pad
        mat = jnp.pad(mat, ((0, 0), (0, lane_in - wi_len * cin), (0, 0)))
    return mat.reshape(3 * lane_in, wo_len * cout)


def prepare_params(params, number_of_classes=29, image_shape=32):
    """Fold/permute/pad/cast all weights once; returns device-ready arrays."""
    assert image_shape % 8 == 0
    W = image_shape
    lane_in = ((W * 3 + 127) // 128) * 128                    # 128 for W=32

    cw1 = _fold_conv_weight(params["conv1_w"], W, lane_in, scale=1.0 / 255.0)
    cw2 = _fold_conv_weight(params["conv2_w"], W // 2, (W // 2) * 8)
    cw3 = _fold_conv_weight(params["conv3_w"], W // 4, (W // 4) * 16)
    cb1 = jnp.tile(params["conv1_b"], W // 2).reshape(1, -1)
    cb2 = jnp.tile(params["conv2_b"], W // 4).reshape(1, -1)
    cb3 = jnp.tile(params["conv3_b"], W // 8).reshape(1, -1)

    # fc1 rows permuted so it consumes the kernel's (h, w, c) flatten while
    # matching torch.flatten(NCHW) = (c, h, w) semantics.
    s = W // 8
    hh = jnp.arange(s).reshape(s, 1, 1)
    ww = jnp.arange(s).reshape(1, s, 1)
    cc = jnp.arange(32).reshape(1, 1, 32)
    perm = (cc * (s * s) + hh * s + ww).reshape(-1)
    fw1 = params["fc1_w"][perm, :]

    # fc3 padded to 128 lanes: zero weight columns, -1e30 bias -> prob 0.
    ncp = max(128, ((number_of_classes + 127) // 128) * 128)
    fw3 = jnp.pad(params["fc3_w"], ((0, 0), (0, ncp - number_of_classes)))
    fb3 = jnp.pad(params["fc3_b"], (0, ncp - number_of_classes),
                  constant_values=-1e30)

    bf16 = jnp.bfloat16
    return {
        "cw1": cw1.astype(bf16), "cb1": cb1.astype(jnp.float32),
        "cw2": cw2.astype(bf16), "cb2": cb2.astype(jnp.float32),
        "cw3": cw3.astype(bf16), "cb3": cb3.astype(jnp.float32),
        "fw1": fw1.astype(bf16),
        "fb1": params["fc1_b"].reshape(1, -1).astype(jnp.float32),
        "fw2": params["fc2_w"].astype(bf16),
        "fb2": params["fc2_b"].reshape(1, -1).astype(jnp.float32),
        "fw3": fw3.astype(bf16),
        "fb3": fb3.reshape(1, -1).astype(jnp.float32),
    }


# ----------------------------------------------------------------------------
# Forward pass (matches MyNetwork.forward)
# ----------------------------------------------------------------------------
@functools.partial(jax.jit, static_argnames=("number_of_classes",))
def mynetwork_forward(prepared, x_nchw, number_of_classes=29):
    # x_nchw: [B, 3, H, W] float32 in 0..255 (1/255 folded into conv1 weights)
    B, C, H, W = x_nchw.shape
    Bp, tile_b = _batch_tiling(B)
    lane_in = prepared["cw1"].shape[0] // 3
    ncp = prepared["fw3"].shape[1]

    # Only remaining XLA glue: input layout (one row-slab per image row).
    x = jnp.transpose(x_nchw, (2, 0, 3, 1)).reshape(H, B, W * C)
    x = jnp.pad(x, ((0, 0), (0, Bp - B), (0, lane_in - W * C)))

    weight_args = [prepared["cw1"], prepared["cb1"], prepared["cw2"],
                   prepared["cb2"], prepared["cw3"], prepared["cb3"],
                   prepared["fw1"], prepared["fb1"], prepared["fw2"],
                   prepared["fb2"], prepared["fw3"], prepared["fb3"]]
    weight_specs = [pl.BlockSpec(a.shape, lambda i: (0, 0)) for a in weight_args]

    out = pl.pallas_call(
        _mynetwork_kernel,
        out_shape=jax.ShapeDtypeStruct((Bp, ncp), jnp.float32),
        grid_spec=pltpu.PrefetchScalarGridSpec(
            num_scalar_prefetch=0,
            grid=(Bp // tile_b,),
            in_specs=[pl.BlockSpec((H, tile_b, lane_in), lambda i: (0, i, 0))]
                     + weight_specs,
            out_specs=pl.BlockSpec((tile_b, ncp), lambda i: (i, 0)),
        ),
        compiler_params=pltpu.CompilerParams(
            dimension_semantics=("parallel",),
            vmem_limit_bytes=_VMEM_LIMIT),
    )(x, *weight_args)
    return out[:B, :number_of_classes]


# ----------------------------------------------------------------------------
# Parameters (deterministic synthetic init — shapes from MyNetwork.__init__,
# fc weights stored transposed: x @ W, rows in torch (C,H,W)-flatten order)
# ----------------------------------------------------------------------------
def init_params(number_of_classes=29, image_shape=32, seed=42):
    key = jax.random.PRNGKey(seed)
    ks = jax.random.split(key, 12)
    s = image_shape // 8
    n = jax.random.normal
    return {
        "conv1_w": 0.2 * n(ks[0], (8, 3, 3, 3), jnp.float32),
        "conv1_b": 0.1 * n(ks[1], (8,), jnp.float32),
        "conv2_w": 0.2 * n(ks[2], (16, 8, 3, 3), jnp.float32),
        "conv2_b": 0.1 * n(ks[3], (16,), jnp.float32),
        "conv3_w": 0.2 * n(ks[4], (32, 16, 3, 3), jnp.float32),
        "conv3_b": 0.1 * n(ks[5], (32,), jnp.float32),
        "fc1_w": 0.1 * n(ks[6], (32 * s * s, 128), jnp.float32),
        "fc1_b": 0.1 * n(ks[7], (128,), jnp.float32),
        "fc2_w": 0.15 * n(ks[8], (128, 256), jnp.float32),
        "fc2_b": 0.1 * n(ks[9], (256,), jnp.float32),
        "fc3_w": 0.06 * n(ks[10], (256, number_of_classes), jnp.float32),
        "fc3_b": 0.05 * n(ks[11], (number_of_classes,), jnp.float32),
    }


# ----------------------------------------------------------------------------
# Pure-JAX reference (for correctness checking only)
# ----------------------------------------------------------------------------
def reference_forward(params, x_nchw):
    x = x_nchw / 255.0

    def conv(h, w, b):
        y = jax.lax.conv_general_dilated(
            h, w, window_strides=(2, 2), padding=((1, 1), (1, 1)),
            dimension_numbers=("NCHW", "OIHW", "NCHW"))
        return jax.nn.relu(y + b.reshape(1, -1, 1, 1))

    x = conv(x, params["conv1_w"], params["conv1_b"])
    x = conv(x, params["conv2_w"], params["conv2_b"])
    x = conv(x, params["conv3_w"], params["conv3_b"])
    x = x.reshape(x.shape[0], -1)                           # (C,H,W) flatten
    x = jax.nn.relu(x @ params["fc1_w"] + params["fc1_b"])
    x = jax.nn.relu(x @ params["fc2_w"] + params["fc2_b"])
    return jax.nn.softmax(x @ params["fc3_w"] + params["fc3_b"], axis=-1)


if __name__ == "__main__":
    B, C, H, W = 2, 3, 32, 32
    key = jax.random.PRNGKey(0)
    x = jax.random.uniform(key, (B, C, H, W), jnp.float32,
                           minval=0.0, maxval=255.0)
    params = init_params(number_of_classes=29, image_shape=32)
    prepared = prepare_params(params, number_of_classes=29, image_shape=32)

    out = jax.block_until_ready(mynetwork_forward(prepared, x))

    assert out.shape == (B, 29), out.shape
    # exact softmax normalization (pad classes contribute exactly 0)
    assert jnp.allclose(jnp.sum(out, axis=1), 1.0, atol=1e-5)
    # match the pure-JAX reference (bf16 MXU operands -> tightened tolerance)
    ref = reference_forward(params, x)
    err = float(jnp.max(jnp.abs(out - ref)))
    assert jnp.allclose(out, ref, rtol=0.05, atol=2e-3), err
    print("KERNEL_OK")
</pallas_src>

<mosaic_0001>
module attributes {stable_mosaic.version = 11 : i64} {
  func.func @_mynetwork_kernel(%arg0: i32, %arg1: memref<32x8x128xf32, #tpu.memory_space<vmem>>, %arg2: memref<384x128xbf16, #tpu.memory_space<vmem>>, %arg3: memref<1x128xf32, #tpu.memory_space<vmem>>, %arg4: memref<384x128xbf16, #tpu.memory_space<vmem>>, %arg5: memref<1x128xf32, #tpu.memory_space<vmem>>, %arg6: memref<384x128xbf16, #tpu.memory_space<vmem>>, %arg7: memref<1x128xf32, #tpu.memory_space<vmem>>, %arg8: memref<512x128xbf16, #tpu.memory_space<vmem>>, %arg9: memref<1x128xf32, #tpu.memory_space<vmem>>, %arg10: memref<128x256xbf16, #tpu.memory_space<vmem>>, %arg11: memref<1x256xf32, #tpu.memory_space<vmem>>, %arg12: memref<256x128xbf16, #tpu.memory_space<vmem>>, %arg13: memref<1x128xf32, #tpu.memory_space<vmem>>, %arg14: memref<8x128xf32, #tpu.memory_space<vmem>>) attributes {dimension_semantics = [#tpu.dimension_semantics<parallel>], iteration_bounds = array<i64: 2>, scalar_prefetch = 0 : i64, scratch_operands = 0 : i64, tpu.core_type = #tpu.core_type<tc>, window_params = [{transform_indices = @transform_0, window_bounds = array<i64: 32, 8, 128>}, {pipeline_mode = #tpu.pipeline_mode<synchronous>, transform_indices = @transform_1, window_bounds = array<i64: 384, 128>}, {pipeline_mode = #tpu.pipeline_mode<synchronous>, transform_indices = @transform_2, window_bounds = array<i64: 1, 128>}, {pipeline_mode = #tpu.pipeline_mode<synchronous>, transform_indices = @transform_3, window_bounds = array<i64: 384, 128>}, {pipeline_mode = #tpu.pipeline_mode<synchronous>, transform_indices = @transform_4, window_bounds = array<i64: 1, 128>}, {pipeline_mode = #tpu.pipeline_mode<synchronous>, transform_indices = @transform_5, window_bounds = array<i64: 384, 128>}, {pipeline_mode = #tpu.pipeline_mode<synchronous>, transform_indices = @transform_6, window_bounds = array<i64: 1, 128>}, {pipeline_mode = #tpu.pipeline_mode<synchronous>, transform_indices = @transform_7, window_bounds = array<i64: 512, 128>}, {pipeline_mode = #tpu.pipeline_mode<synchronous>, transform_indices = @transform_8, window_bounds = array<i64: 1, 128>}, {pipeline_mode = #tpu.pipeline_mode<synchronous>, transform_indices = @transform_9, window_bounds = array<i64: 128, 256>}, {pipeline_mode = #tpu.pipeline_mode<synchronous>, transform_indices = @transform_10, window_bounds = array<i64: 1, 256>}, {pipeline_mode = #tpu.pipeline_mode<synchronous>, transform_indices = @transform_11, window_bounds = array<i64: 256, 128>}, {pipeline_mode = #tpu.pipeline_mode<synchronous>, transform_indices = @transform_12, window_bounds = array<i64: 1, 128>}, {transform_indices = @transform_13, window_bounds = array<i64: 8, 128>}]} {
    %c0 = arith.constant 0 : index
    %c0_0 = arith.constant 0 : index
    %c0_1 = arith.constant 0 : index
    %0 = vector.load %arg1[%c0, %c0_0, %c0_1] : memref<32x8x128xf32, #tpu.memory_space<vmem>>, vector<1x8x128xf32>
    %1 = vector.shape_cast %0 : vector<1x8x128xf32> to vector<8x128xf32>
    %c1 = arith.constant 1 : index
    %c0_2 = arith.constant 0 : index
    %c0_3 = arith.constant 0 : index
    %2 = vector.load %arg1[%c1, %c0_2, %c0_3] : memref<32x8x128xf32, #tpu.memory_space<vmem>>, vector<1x8x128xf32>
    %3 = vector.shape_cast %2 : vector<1x8x128xf32> to vector<8x128xf32>
    %c2 = arith.constant 2 : index
    %c0_4 = arith.constant 0 : index
    %c0_5 = arith.constant 0 : index
    %4 = vector.load %arg1[%c2, %c0_4, %c0_5] : memref<32x8x128xf32, #tpu.memory_space<vmem>>, vector<1x8x128xf32>
    %5 = vector.shape_cast %4 : vector<1x8x128xf32> to vector<8x128xf32>
    %c3 = arith.constant 3 : index
    %c0_6 = arith.constant 0 : index
    %c0_7 = arith.constant 0 : index
    %6 = vector.load %arg1[%c3, %c0_6, %c0_7] : memref<32x8x128xf32, #tpu.memory_space<vmem>>, vector<1x8x128xf32>
    %7 = vector.shape_cast %6 : vector<1x8x128xf32> to vector<8x128xf32>
    %c4 = arith.constant 4 : index
    %c0_8 = arith.constant 0 : index
    %c0_9 = arith.constant 0 : index
    %8 = vector.load %arg1[%c4, %c0_8, %c0_9] : memref<32x8x128xf32, #tpu.memory_space<vmem>>, vector<1x8x128xf32>
    %9 = vector.shape_cast %8 : vector<1x8x128xf32> to vector<8x128xf32>
    %c5 = arith.constant 5 : index
    %c0_10 = arith.constant 0 : index
    %c0_11 = arith.constant 0 : index
    %10 = vector.load %arg1[%c5, %c0_10, %c0_11] : memref<32x8x128xf32, #tpu.memory_space<vmem>>, vector<1x8x128xf32>
    %11 = vector.shape_cast %10 : vector<1x8x128xf32> to vector<8x128xf32>
    %c6 = arith.constant 6 : index
    %c0_12 = arith.constant 0 : index
    %c0_13 = arith.constant 0 : index
    %12 = vector.load %arg1[%c6, %c0_12, %c0_13] : memref<32x8x128xf32, #tpu.memory_space<vmem>>, vector<1x8x128xf32>
    %13 = vector.shape_cast %12 : vector<1x8x128xf32> to vector<8x128xf32>
    %c7 = arith.constant 7 : index
    %c0_14 = arith.constant 0 : index
    %c0_15 = arith.constant 0 : index
    %14 = vector.load %arg1[%c7, %c0_14, %c0_15] : memref<32x8x128xf32, #tpu.memory_space<vmem>>, vector<1x8x128xf32>
    %15 = vector.shape_cast %14 : vector<1x8x128xf32> to vector<8x128xf32>
    %c8 = arith.constant 8 : index
    %c0_16 = arith.constant 0 : index
    %c0_17 = arith.constant 0 : index
    %16 = vector.load %arg1[%c8, %c0_16, %c0_17] : memref<32x8x128xf32, #tpu.memory_space<vmem>>, vector<1x8x128xf32>
    %17 = vector.shape_cast %16 : vector<1x8x128xf32> to vector<8x128xf32>
    %c9 = arith.constant 9 : index
    %c0_18 = arith.constant 0 : index
    %c0_19 = arith.constant 0 : index
    %18 = vector.load %arg1[%c9, %c0_18, %c0_19] : memref<32x8x128xf32, #tpu.memory_space<vmem>>, vector<1x8x128xf32>
    %19 = vector.shape_cast %18 : vector<1x8x128xf32> to vector<8x128xf32>
    %c10 = arith.constant 10 : index
    %c0_20 = arith.constant 0 : index
    %c0_21 = arith.constant 0 : index
    %20 = vector.load %arg1[%c10, %c0_20, %c0_21] : memref<32x8x128xf32, #tpu.memory_space<vmem>>, vector<1x8x128xf32>
    %21 = vector.shape_cast %20 : vector<1x8x128xf32> to vector<8x128xf32>
    %c11 = arith.constant 11 : index
    %c0_22 = arith.constant 0 : index
    %c0_23 = arith.constant 0 : index
    %22 = vector.load %arg1[%c11, %c0_22, %c0_23] : memref<32x8x128xf32, #tpu.memory_space<vmem>>, vector<1x8x128xf32>
    %23 = vector.shape_cast %22 : vector<1x8x128xf32> to vector<8x128xf32>
    %c12 = arith.constant 12 : index
    %c0_24 = arith.constant 0 : index
    %c0_25 = arith.constant 0 : index
    %24 = vector.load %arg1[%c12, %c0_24, %c0_25] : memref<32x8x128xf32, #tpu.memory_space<vmem>>, vector<1x8x128xf32>
    %25 = vector.shape_cast %24 : vector<1x8x128xf32> to vector<8x128xf32>
    %c13 = arith.constant 13 : index
    %c0_26 = arith.constant 0 : index
    %c0_27 = arith.constant 0 : index
    %26 = vector.load %arg1[%c13, %c0_26, %c0_27] : memref<32x8x128xf32, #tpu.memory_space<vmem>>, vector<1x8x128xf32>
    %27 = vector.shape_cast %26 : vector<1x8x128xf32> to vector<8x128xf32>
    %c14 = arith.constant 14 : index
    %c0_28 = arith.constant 0 : index
    %c0_29 = arith.constant 0 : index
    %28 = vector.load %arg1[%c14, %c0_28, %c0_29] : memref<32x8x128xf32, #tpu.memory_space<vmem>>, vector<1x8x128xf32>
    %29 = vector.shape_cast %28 : vector<1x8x128xf32> to vector<8x128xf32>
    %c15 = arith.constant 15 : index
    %c0_30 = arith.constant 0 : index
    %c0_31 = arith.constant 0 : index
    %30 = vector.load %arg1[%c15, %c0_30, %c0_31] : memref<32x8x128xf32, #tpu.memory_space<vmem>>, vector<1x8x128xf32>
    %31 = vector.shape_cast %30 : vector<1x8x128xf32> to vector<8x128xf32>
    %c16 = arith.constant 16 : index
    %c0_32 = arith.constant 0 : index
    %c0_33 = arith.constant 0 : index
    %32 = vector.load %arg1[%c16, %c0_32, %c0_33] : memref<32x8x128xf32, #tpu.memory_space<vmem>>, vector<1x8x128xf32>
    %33 = vector.shape_cast %32 : vector<1x8x128xf32> to vector<8x128xf32>
    %c17 = arith.constant 17 : index
    %c0_34 = arith.constant 0 : index
    %c0_35 = arith.constant 0 : index
    %34 = vector.load %arg1[%c17, %c0_34, %c0_35] : memref<32x8x128xf32, #tpu.memory_space<vmem>>, vector<1x8x128xf32>
    %35 = vector.shape_cast %34 : vector<1x8x128xf32> to vector<8x128xf32>
    %c18 = arith.constant 18 : index
    %c0_36 = arith.constant 0 : index
    %c0_37 = arith.constant 0 : index
    %36 = vector.load %arg1[%c18, %c0_36, %c0_37] : memref<32x8x128xf32, #tpu.memory_space<vmem>>, vector<1x8x128xf32>
    %37 = vector.shape_cast %36 : vector<1x8x128xf32> to vector<8x128xf32>
    %c19 = arith.constant 19 : index
    %c0_38 = arith.constant 0 : index
    %c0_39 = arith.constant 0 : index
    %38 = vector.load %arg1[%c19, %c0_38, %c0_39] : memref<32x8x128xf32, #tpu.memory_space<vmem>>, vector<1x8x128xf32>
    %39 = vector.shape_cast %38 : vector<1x8x128xf32> to vector<8x128xf32>
    %c20 = arith.constant 20 : index
    %c0_40 = arith.constant 0 : index
    %c0_41 = arith.constant 0 : index
    %40 = vector.load %arg1[%c20, %c0_40, %c0_41] : memref<32x8x128xf32, #tpu.memory_space<vmem>>, vector<1x8x128xf32>
    %41 = vector.shape_cast %40 : vector<1x8x128xf32> to vector<8x128xf32>
    %c21 = arith.constant 21 : index
    %c0_42 = arith.constant 0 : index
    %c0_43 = arith.constant 0 : index
    %42 = vector.load %arg1[%c21, %c0_42, %c0_43] : memref<32x8x128xf32, #tpu.memory_space<vmem>>, vector<1x8x128xf32>
    %43 = vector.shape_cast %42 : vector<1x8x128xf32> to vector<8x128xf32>
    %c22 = arith.constant 22 : index
    %c0_44 = arith.constant 0 : index
    %c0_45 = arith.constant 0 : index
    %44 = vector.load %arg1[%c22, %c0_44, %c0_45] : memref<32x8x128xf32, #tpu.memory_space<vmem>>, vector<1x8x128xf32>
    %45 = vector.shape_cast %44 : vector<1x8x128xf32> to vector<8x128xf32>
    %c23 = arith.constant 23 : index
    %c0_46 = arith.constant 0 : index
    %c0_47 = arith.constant 0 : index
    %46 = vector.load %arg1[%c23, %c0_46, %c0_47] : memref<32x8x128xf32, #tpu.memory_space<vmem>>, vector<1x8x128xf32>
    %47 = vector.shape_cast %46 : vector<1x8x128xf32> to vector<8x128xf32>
    %c24 = arith.constant 24 : index
    %c0_48 = arith.constant 0 : index
    %c0_49 = arith.constant 0 : index
    %48 = vector.load %arg1[%c24, %c0_48, %c0_49] : memref<32x8x128xf32, #tpu.memory_space<vmem>>, vector<1x8x128xf32>
    %49 = vector.shape_cast %48 : vector<1x8x128xf32> to vector<8x128xf32>
    %c25 = arith.constant 25 : index
    %c0_50 = arith.constant 0 : index
    %c0_51 = arith.constant 0 : index
    %50 = vector.load %arg1[%c25, %c0_50, %c0_51] : memref<32x8x128xf32, #tpu.memory_space<vmem>>, vector<1x8x128xf32>
    %51 = vector.shape_cast %50 : vector<1x8x128xf32> to vector<8x128xf32>
    %c26 = arith.constant 26 : index
    %c0_52 = arith.constant 0 : index
    %c0_53 = arith.constant 0 : index
    %52 = vector.load %arg1[%c26, %c0_52, %c0_53] : memref<32x8x128xf32, #tpu.memory_space<vmem>>, vector<1x8x128xf32>
    %53 = vector.shape_cast %52 : vector<1x8x128xf32> to vector<8x128xf32>
    %c27 = arith.constant 27 : index
    %c0_54 = arith.constant 0 : index
    %c0_55 = arith.constant 0 : index
    %54 = vector.load %arg1[%c27, %c0_54, %c0_55] : memref<32x8x128xf32, #tpu.memory_space<vmem>>, vector<1x8x128xf32>
    %55 = vector.shape_cast %54 : vector<1x8x128xf32> to vector<8x128xf32>
    %c28 = arith.constant 28 : index
    %c0_56 = arith.constant 0 : index
    %c0_57 = arith.constant 0 : index
    %56 = vector.load %arg1[%c28, %c0_56, %c0_57] : memref<32x8x128xf32, #tpu.memory_space<vmem>>, vector<1x8x128xf32>
    %57 = vector.shape_cast %56 : vector<1x8x128xf32> to vector<8x128xf32>
    %c29 = arith.constant 29 : index
    %c0_58 = arith.constant 0 : index
    %c0_59 = arith.constant 0 : index
    %58 = vector.load %arg1[%c29, %c0_58, %c0_59] : memref<32x8x128xf32, #tpu.memory_space<vmem>>, vector<1x8x128xf32>
    %59 = vector.shape_cast %58 : vector<1x8x128xf32> to vector<8x128xf32>
    %c30 = arith.constant 30 : index
    %c0_60 = arith.constant 0 : index
    %c0_61 = arith.constant 0 : index
    %60 = vector.load %arg1[%c30, %c0_60, %c0_61] : memref<32x8x128xf32, #tpu.memory_space<vmem>>, vector<1x8x128xf32>
    %61 = vector.shape_cast %60 : vector<1x8x128xf32> to vector<8x128xf32>
    %c31 = arith.constant 31 : index
    %c0_62 = arith.constant 0 : index
    %c0_63 = arith.constant 0 : index
    %62 = vector.load %arg1[%c31, %c0_62, %c0_63] : memref<32x8x128xf32, #tpu.memory_space<vmem>>, vector<1x8x128xf32>
    %63 = vector.shape_cast %62 : vector<1x8x128xf32> to vector<8x128xf32>
    %cst = arith.constant 0.000000e+00 : f32
    %64 = vector.broadcast %cst : f32 to vector<8x128xf32>
    %65 = tpu.concatenate %64, %1, %3 in 1 : vector<8x128xf32>, vector<8x128xf32>, vector<8x128xf32> -> vector<8x384xf32>
    %66 = tpu.concatenate %3, %5, %7 in 1 : vector<8x128xf32>, vector<8x128xf32>, vector<8x128xf32> -> vector<8x384xf32>
    %67 = tpu.concatenate %7, %9, %11 in 1 : vector<8x128xf32>, vector<8x128xf32>, vector<8x128xf32> -> vector<8x384xf32>
    %68 = tpu.concatenate %11, %13, %15 in 1 : vector<8x128xf32>, vector<8x128xf32>, vector<8x128xf32> -> vector<8x384xf32>
    %69 = tpu.concatenate %15, %17, %19 in 1 : vector<8x128xf32>, vector<8x128xf32>, vector<8x128xf32> -> vector<8x384xf32>
    %70 = tpu.concatenate %19, %21, %23 in 1 : vector<8x128xf32>, vector<8x128xf32>, vector<8x128xf32> -> vector<8x384xf32>
    %71 = tpu.concatenate %23, %25, %27 in 1 : vector<8x128xf32>, vector<8x128xf32>, vector<8x128xf32> -> vector<8x384xf32>
    %72 = tpu.concatenate %27, %29, %31 in 1 : vector<8x128xf32>, vector<8x128xf32>, vector<8x128xf32> -> vector<8x384xf32>
    %73 = tpu.concatenate %31, %33, %35 in 1 : vector<8x128xf32>, vector<8x128xf32>, vector<8x128xf32> -> vector<8x384xf32>
    %74 = tpu.concatenate %35, %37, %39 in 1 : vector<8x128xf32>, vector<8x128xf32>, vector<8x128xf32> -> vector<8x384xf32>
    %75 = tpu.concatenate %39, %41, %43 in 1 : vector<8x128xf32>, vector<8x128xf32>, vector<8x128xf32> -> vector<8x384xf32>
    %76 = tpu.concatenate %43, %45, %47 in 1 : vector<8x128xf32>, vector<8x128xf32>, vector<8x128xf32> -> vector<8x384xf32>
    %77 = tpu.concatenate %47, %49, %51 in 1 : vector<8x128xf32>, vector<8x128xf32>, vector<8x128xf32> -> vector<8x384xf32>
    %78 = tpu.concatenate %51, %53, %55 in 1 : vector<8x128xf32>, vector<8x128xf32>, vector<8x128xf32> -> vector<8x384xf32>
    %79 = tpu.concatenate %55, %57, %59 in 1 : vector<8x128xf32>, vector<8x128xf32>, vector<8x128xf32> -> vector<8x384xf32>
    %80 = tpu.concatenate %59, %61, %63 in 1 : vector<8x128xf32>, vector<8x128xf32>, vector<8x128xf32> -> vector<8x384xf32>
    %81 = tpu.concatenate %65, %66, %67, %68, %69, %70, %71, %72, %73, %74, %75, %76, %77, %78, %79, %80 in 0 : vector<8x384xf32>, vector<8x384xf32>, vector<8x384xf32>, vector<8x384xf32>, vector<8x384xf32>, vector<8x384xf32>, vector<8x384xf32>, vector<8x384xf32>, vector<8x384xf32>, vector<8x384xf32>, vector<8x384xf32>, vector<8x384xf32>, vector<8x384xf32>, vector<8x384xf32>, vector<8x384xf32>, vector<8x384xf32> -> vector<128x384xf32>
    %82 = arith.truncf %81 : vector<128x384xf32> to vector<128x384xbf16>
    %c0_64 = arith.constant 0 : index
    %c0_65 = arith.constant 0 : index
    %83 = vector.load %arg2[%c0_64, %c0_65] : memref<384x128xbf16, #tpu.memory_space<vmem>>, vector<384x128xbf16>
    %cst_66 = arith.constant dense<0.000000e+00> : vector<128x128xf32>
    %84 = tpu.matmul %82, %83, %cst_66 {dimension_numbers = #tpu.dot_dimension_numbers<[1], [0], [0], [1], [0, 0, 1, 1], [], []>} : vector<128x384xbf16>, vector<384x128xbf16>, vector<128x128xf32> -> vector<128x128xf32>
    %c0_67 = arith.constant 0 : index
    %c0_68 = arith.constant 0 : index
    %85 = vector.load %arg3[%c0_67, %c0_68] : memref<1x128xf32, #tpu.memory_space<vmem>>, vector<1x128xf32>
    %86 = vector.broadcast %85 : vector<1x128xf32> to vector<128x128xf32>
    %87 = arith.addf %84, %86 : vector<128x128xf32>
    %cst_69 = arith.constant 0.000000e+00 : f32
    %88 = vector.broadcast %cst_69 : f32 to vector<128x128xf32>
    %89 = arith.maximumf %87, %88 : vector<128x128xf32>
    %90 = vector.extract_strided_slice %89 {offsets = [0, 0], sizes = [8, 128], strides = [1, 1]} : vector<128x128xf32> to vector<8x128xf32>
    %91 = vector.extract_strided_slice %89 {offsets = [8, 0], sizes = [8, 128], strides = [1, 1]} : vector<128x128xf32> to vector<8x128xf32>
    %92 = vector.extract_strided_slice %89 {offsets = [16, 0], sizes = [8, 128], strides = [1, 1]} : vector<128x128xf32> to vector<8x128xf32>
    %93 = vector.extract_strided_slice %89 {offsets = [24, 0], sizes = [8, 128], strides = [1, 1]} : vector<128x128xf32> to vector<8x128xf32>
    %94 = vector.extract_strided_slice %89 {offsets = [32, 0], sizes = [8, 128], strides = [1, 1]} : vector<128x128xf32> to vector<8x128xf32>
    %95 = vector.extract_strided_slice %89 {offsets = [40, 0], sizes = [8, 128], strides = [1, 1]} : vector<128x128xf32> to vector<8x128xf32>
    %96 = vector.extract_strided_slice %89 {offsets = [48, 0], sizes = [8, 128], strides = [1, 1]} : vector<128x128xf32> to vector<8x128xf32>
    %97 = vector.extract_strided_slice %89 {offsets = [56, 0], sizes = [8, 128], strides = [1, 1]} : vector<128x128xf32> to vector<8x128xf32>
    %98 = vector.extract_strided_slice %89 {offsets = [64, 0], sizes = [8, 128], strides = [1, 1]} : vector<128x128xf32> to vector<8x128xf32>
    %99 = vector.extract_strided_slice %89 {offsets = [72, 0], sizes = [8, 128], strides = [1, 1]} : vector<128x128xf32> to vector<8x128xf32>
    %100 = vector.extract_strided_slice %89 {offsets = [80, 0], sizes = [8, 128], strides = [1, 1]} : vector<128x128xf32> to vector<8x128xf32>
    %101 = vector.extract_strided_slice %89 {offsets = [88, 0], sizes = [8, 128], strides = [1, 1]} : vector<128x128xf32> to vector<8x128xf32>
    %102 = vector.extract_strided_slice %89 {offsets = [96, 0], sizes = [8, 128], strides = [1, 1]} : vector<128x128xf32> to vector<8x128xf32>
    %103 = vector.extract_strided_slice %89 {offsets = [104, 0], sizes = [8, 128], strides = [1, 1]} : vector<128x128xf32> to vector<8x128xf32>
    %104 = vector.extract_strided_slice %89 {offsets = [112, 0], sizes = [8, 128], strides = [1, 1]} : vector<128x128xf32> to vector<8x128xf32>
    %105 = vector.extract_strided_slice %89 {offsets = [120, 0], sizes = [8, 128], strides = [1, 1]} : vector<128x128xf32> to vector<8x128xf32>
    %cst_70 = arith.constant 0.000000e+00 : f32
    %106 = vector.broadcast %cst_70 : f32 to vector<8x128xf32>
    %107 = tpu.concatenate %106, %90, %91 in 1 : vector<8x128xf32>, vector<8x128xf32>, vector<8x128xf32> -> vector<8x384xf32>
    %108 = tpu.concatenate %91, %92, %93 in 1 : vector<8x128xf32>, vector<8x128xf32>, vector<8x128xf32> -> vector<8x384xf32>
    %109 = tpu.concatenate %93, %94, %95 in 1 : vector<8x128xf32>, vector<8x128xf32>, vector<8x128xf32> -> vector<8x384xf32>
    %110 = tpu.concatenate %95, %96, %97 in 1 : vector<8x128xf32>, vector<8x128xf32>, vector<8x128xf32> -> vector<8x384xf32>
    %111 = tpu.concatenate %97, %98, %99 in 1 : vector<8x128xf32>, vector<8x128xf32>, vector<8x128xf32> -> vector<8x384xf32>
    %112 = tpu.concatenate %99, %100, %101 in 1 : vector<8x128xf32>, vector<8x128xf32>, vector<8x128xf32> -> vector<8x384xf32>
    %113 = tpu.concatenate %101, %102, %103 in 1 : vector<8x128xf32>, vector<8x128xf32>, vector<8x128xf32> -> vector<8x384xf32>
    %114 = tpu.concatenate %103, %104, %105 in 1 : vector<8x128xf32>, vector<8x128xf32>, vector<8x128xf32> -> vector<8x384xf32>
    %115 = tpu.concatenate %107, %108, %109, %110, %111, %112, %113, %114 in 0 : vector<8x384xf32>, vector<8x384xf32>, vector<8x384xf32>, vector<8x384xf32>, vector<8x384xf32>, vector<8x384xf32>, vector<8x384xf32>, vector<8x384xf32> -> vector<64x384xf32>
    %116 = arith.truncf %115 : vector<64x384xf32> to vector<64x384xbf16>
    %c0_71 = arith.constant 0 : index
    %c0_72 = arith.constant 0 : index
    %117 = vector.load %arg4[%c0_71, %c0_72] : memref<384x128xbf16, #tpu.memory_space<vmem>>, vector<384x128xbf16>
    %cst_73 = arith.constant dense<0.000000e+00> : vector<64x128xf32>
    %118 = tpu.matmul %116, %117, %cst_73 {dimension_numbers = #tpu.dot_dimension_numbers<[1], [0], [0], [1], [0, 0, 1, 1], [], []>} : vector<64x384xbf16>, vector<384x128xbf16>, vector<64x128xf32> -> vector<64x128xf32>
    %c0_74 = arith.constant 0 : index
    %c0_75 = arith.constant 0 : index
    %119 = vector.load %arg5[%c0_74, %c0_75] : memref<1x128xf32, #tpu.memory_space<vmem>>, vector<1x128xf32>
    %120 = vector.broadcast %119 : vector<1x128xf32> to vector<64x128xf32>
    %121 = arith.addf %118, %120 : vector<64x128xf32>
    %cst_76 = arith.constant 0.000000e+00 : f32
    %122 = vector.broadcast %cst_76 : f32 to vector<64x128xf32>
    %123 = arith.maximumf %121, %122 : vector<64x128xf32>
    %124 = vector.extract_strided_slice %123 {offsets = [0, 0], sizes = [8, 128], strides = [1, 1]} : vector<64x128xf32> to vector<8x128xf32>
    %125 = vector.extract_strided_slice %123 {offsets = [8, 0], sizes = [8, 128], strides = [1, 1]} : vector<64x128xf32> to vector<8x128xf32>
    %126 = vector.extract_strided_slice %123 {offsets = [16, 0], sizes = [8, 128], strides = [1, 1]} : vector<64x128xf32> to vector<8x128xf32>
    %127 = vector.extract_strided_slice %123 {offsets = [24, 0], sizes = [8, 128], strides = [1, 1]} : vector<64x128xf32> to vector<8x128xf32>
    %128 = vector.extract_strided_slice %123 {offsets = [32, 0], sizes = [8, 128], strides = [1, 1]} : vector<64x128xf32> to vector<8x128xf32>
    %129 = vector.extract_strided_slice %123 {offsets = [40, 0], sizes = [8, 128], strides = [1, 1]} : vector<64x128xf32> to vector<8x128xf32>
    %130 = vector.extract_strided_slice %123 {offsets = [48, 0], sizes = [8, 128], strides = [1, 1]} : vector<64x128xf32> to vector<8x128xf32>
    %131 = vector.extract_strided_slice %123 {offsets = [56, 0], sizes = [8, 128], strides = [1, 1]} : vector<64x128xf32> to vector<8x128xf32>
    %cst_77 = arith.constant 0.000000e+00 : f32
    %132 = vector.broadcast %cst_77 : f32 to vector<8x128xf32>
    %133 = tpu.concatenate %132, %124, %125 in 1 : vector<8x128xf32>, vector<8x128xf32>, vector<8x128xf32> -> vector<8x384xf32>
    %134 = tpu.concatenate %125, %126, %127 in 1 : vector<8x128xf32>, vector<8x128xf32>, vector<8x128xf32> -> vector<8x384xf32>
    %135 = tpu.concatenate %127, %128, %129 in 1 : vector<8x128xf32>, vector<8x128xf32>, vector<8x128xf32> -> vector<8x384xf32>
    %136 = tpu.concatenate %129, %130, %131 in 1 : vector<8x128xf32>, vector<8x128xf32>, vector<8x128xf32> -> vector<8x384xf32>
    %137 = tpu.concatenate %133, %134, %135, %136 in 0 : vector<8x384xf32>, vector<8x384xf32>, vector<8x384xf32>, vector<8x384xf32> -> vector<32x384xf32>
    %138 = arith.truncf %137 : vector<32x384xf32> to vector<32x384xbf16>
    %c0_78 = arith.constant 0 : index
    %c0_79 = arith.constant 0 : index
    %139 = vector.load %arg6[%c0_78, %c0_79] : memref<384x128xbf16, #tpu.memory_space<vmem>>, vector<384x128xbf16>
    %cst_80 = arith.constant dense<0.000000e+00> : vector<32x128xf32>
    %140 = tpu.matmul %138, %139, %cst_80 {dimension_numbers = #tpu.dot_dimension_numbers<[1], [0], [0], [1], [0, 0, 1, 1], [], []>} : vector<32x384xbf16>, vector<384x128xbf16>, vector<32x128xf32> -> vector<32x128xf32>
    %c0_81 = arith.constant 0 : index
    %c0_82 = arith.constant 0 : index
    %141 = vector.load %arg7[%c0_81, %c0_82] : memref<1x128xf32, #tpu.memory_space<vmem>>, vector<1x128xf32>
    %142 = vector.broadcast %141 : vector<1x128xf32> to vector<32x128xf32>
    %143 = arith.addf %140, %142 : vector<32x128xf32>
    %cst_83 = arith.constant 0.000000e+00 : f32
    %144 = vector.broadcast %cst_83 : f32 to vector<32x128xf32>
    %145 = arith.maximumf %143, %144 : vector<32x128xf32>
    %146 = vector.extract_strided_slice %145 {offsets = [0, 0], sizes = [8, 128], strides = [1, 1]} : vector<32x128xf32> to vector<8x128xf32>
    %147 = vector.extract_strided_slice %145 {offsets = [8, 0], sizes = [8, 128], strides = [1, 1]} : vector<32x128xf32> to vector<8x128xf32>
    %148 = vector.extract_strided_slice %145 {offsets = [16, 0], sizes = [8, 128], strides = [1, 1]} : vector<32x128xf32> to vector<8x128xf32>
    %149 = vector.extract_strided_slice %145 {offsets = [24, 0], sizes = [8, 128], strides = [1, 1]} : vector<32x128xf32> to vector<8x128xf32>
    %150 = tpu.concatenate %146, %147, %148, %149 in 1 : vector<8x128xf32>, vector<8x128xf32>, vector<8x128xf32>, vector<8x128xf32> -> vector<8x512xf32>
    %151 = arith.truncf %150 : vector<8x512xf32> to vector<8x512xbf16>
    %c0_84 = arith.constant 0 : index
    %c0_85 = arith.constant 0 : index
    %152 = vector.load %arg8[%c0_84, %c0_85] : memref<512x128xbf16, #tpu.memory_space<vmem>>, vector<512x128xbf16>
    %cst_86 = arith.constant dense<0.000000e+00> : vector<8x128xf32>
    %153 = tpu.matmul %151, %152, %cst_86 {dimension_numbers = #tpu.dot_dimension_numbers<[1], [0], [0], [1], [0, 0, 1, 1], [], []>} : vector<8x512xbf16>, vector<512x128xbf16>, vector<8x128xf32> -> vector<8x128xf32>
    %c0_87 = arith.constant 0 : index
    %c0_88 = arith.constant 0 : index
    %154 = vector.load %arg9[%c0_87, %c0_88] : memref<1x128xf32, #tpu.memory_space<vmem>>, vector<1x128xf32>
    %155 = vector.broadcast %154 : vector<1x128xf32> to vector<8x128xf32>
    %156 = arith.addf %153, %155 : vector<8x128xf32>
    %cst_89 = arith.constant 0.000000e+00 : f32
    %157 = vector.broadcast %cst_89 : f32 to vector<8x128xf32>
    %158 = arith.maximumf %156, %157 : vector<8x128xf32>
    %159 = arith.truncf %158 : vector<8x128xf32> to vector<8x128xbf16>
    %c0_90 = arith.constant 0 : index
    %c0_91 = arith.constant 0 : index
    %160 = vector.load %arg10[%c0_90, %c0_91] : memref<128x256xbf16, #tpu.memory_space<vmem>>, vector<128x256xbf16>
    %cst_92 = arith.constant dense<0.000000e+00> : vector<8x256xf32>
    %161 = tpu.matmul %159, %160, %cst_92 {dimension_numbers = #tpu.dot_dimension_numbers<[1], [0], [0], [1], [0, 0, 1, 1], [], []>} : vector<8x128xbf16>, vector<128x256xbf16>, vector<8x256xf32> -> vector<8x256xf32>
    %c0_93 = arith.constant 0 : index
    %c0_94 = arith.constant 0 : index
    %162 = vector.load %arg11[%c0_93, %c0_94] : memref<1x256xf32, #tpu.memory_space<vmem>>, vector<1x256xf32>
    %163 = vector.broadcast %162 : vector<1x256xf32> to vector<8x256xf32>
    %164 = arith.addf %161, %163 : vector<8x256xf32>
    %cst_95 = arith.constant 0.000000e+00 : f32
    %165 = vector.broadcast %cst_95 : f32 to vector<8x256xf32>
    %166 = arith.maximumf %164, %165 : vector<8x256xf32>
    %167 = arith.truncf %166 : vector<8x256xf32> to vector<8x256xbf16>
    %c0_96 = arith.constant 0 : index
    %c0_97 = arith.constant 0 : index
    %168 = vector.load %arg12[%c0_96, %c0_97] : memref<256x128xbf16, #tpu.memory_space<vmem>>, vector<256x128xbf16>
    %cst_98 = arith.constant dense<0.000000e+00> : vector<8x128xf32>
    %169 = tpu.matmul %167, %168, %cst_98 {dimension_numbers = #tpu.dot_dimension_numbers<[1], [0], [0], [1], [0, 0, 1, 1], [], []>} : vector<8x256xbf16>, vector<256x128xbf16>, vector<8x128xf32> -> vector<8x128xf32>
    %c0_99 = arith.constant 0 : index
    %c0_100 = arith.constant 0 : index
    %170 = vector.load %arg13[%c0_99, %c0_100] : memref<1x128xf32, #tpu.memory_space<vmem>>, vector<1x128xf32>
    %171 = vector.broadcast %170 : vector<1x128xf32> to vector<8x128xf32>
    %172 = arith.addf %169, %171 : vector<8x128xf32>
    %cst_101 = arith.constant dense<0xFF800000> : vector<8xf32>
    %173 = vector.multi_reduction <maximumf>, %172, %cst_101 [1] : vector<8x128xf32> to vector<8xf32>
    %174 = vector.shape_cast %173 : vector<8xf32> to vector<8x1xf32>
    %175 = vector.broadcast %174 : vector<8x1xf32> to vector<8x128xf32>
    %176 = arith.subf %172, %175 : vector<8x128xf32>
    %177 = math.exp %176 : vector<8x128xf32>
    %cst_102 = arith.constant dense<0.000000e+00> : vector<8xf32>
    %178 = vector.multi_reduction <add>, %177, %cst_102 [1] : vector<8x128xf32> to vector<8xf32>
    %179 = vector.shape_cast %178 : vector<8xf32> to vector<8x1xf32>
    %180 = vector.broadcast %179 : vector<8x1xf32> to vector<8x128xf32>
    %181 = arith.divf %177, %180 : vector<8x128xf32>
    %c0_103 = arith.constant 0 : index
    %c0_104 = arith.constant 0 : index
    %182 = vector.load %arg14[%c0_103, %c0_104] : memref<8x128xf32, #tpu.memory_space<vmem>>, vector<8x128xf32>
    tpu.vector_store %arg14[%c0_103, %c0_104], %181 {strides = array<i32>} : memref<8x128xf32, #tpu.memory_space<vmem>>, vector<8x128xf32>,
    return
  }
  func.func @transform_0(%arg0: i32) -> (i32, i32, i32) {
    %c0_i32 = arith.constant 0 : i32
    %c0_i32_0 = arith.constant 0 : i32
    %c0_i32_1 = arith.constant 0 : i32
    return %c0_i32, %arg0, %c0_i32_0 : i32, i32, i32
  }
  func.func @transform_1(%arg0: i32) -> (i32, i32) {
    %c0_i32 = arith.constant 0 : i32
    %c0_i32_0 = arith.constant 0 : i32
    %c0_i32_1 = arith.constant 0 : i32
    return %c0_i32, %c0_i32_0 : i32, i32
  }
  func.func @transform_2(%arg0: i32) -> (i32, i32) {
    %c0_i32 = arith.constant 0 : i32
    %c0_i32_0 = arith.constant 0 : i32
    %c0_i32_1 = arith.constant 0 : i32
    return %c0_i32, %c0_i32_0 : i32, i32
  }
  func.func @transform_3(%arg0: i32) -> (i32, i32) {
    %c0_i32 = arith.constant 0 : i32
    %c0_i32_0 = arith.constant 0 : i32
    %c0_i32_1 = arith.constant 0 : i32
    return %c0_i32, %c0_i32_0 : i32, i32
  }
  func.func @transform_4(%arg0: i32) -> (i32, i32) {
    %c0_i32 = arith.constant 0 : i32
    %c0_i32_0 = arith.constant 0 : i32
    %c0_i32_1 = arith.constant 0 : i32
    return %c0_i32, %c0_i32_0 : i32, i32
  }
  func.func @transform_5(%arg0: i32) -> (i32, i32) {
    %c0_i32 = arith.constant 0 : i32
    %c0_i32_0 = arith.constant 0 : i32
    %c0_i32_1 = arith.constant 0 : i32
    return %c0_i32, %c0_i32_0 : i32, i32
  }
  func.func @transform_6(%arg0: i32) -> (i32, i32) {
    %c0_i32 = arith.constant 0 : i32
    %c0_i32_0 = arith.constant 0 : i32
    %c0_i32_1 = arith.constant 0 : i32
    return %c0_i32, %c0_i32_0 : i32, i32
  }
  func.func @transform_7(%arg0: i32) -> (i32, i32) {
    %c0_i32 = arith.constant 0 : i32
    %c0_i32_0 = arith.constant 0 : i32
    %c0_i32_1 = arith.constant 0 : i32
    return %c0_i32, %c0_i32_0 : i32, i32
  }
  func.func @transform_8(%arg0: i32) -> (i32, i32) {
    %c0_i32 = arith.constant 0 : i32
    %c0_i32_0 = arith.constant 0 : i32
    %c0_i32_1 = arith.constant 0 : i32
    return %c0_i32, %c0_i32_0 : i32, i32
  }
  func.func @transform_9(%arg0: i32) -> (i32, i32) {
    %c0_i32 = arith.constant 0 : i32
    %c0_i32_0 = arith.constant 0 : i32
    %c0_i32_1 = arith.constant 0 : i32
    return %c0_i32, %c0_i32_0 : i32, i32
  }
  func.func @transform_10(%arg0: i32) -> (i32, i32) {
    %c0_i32 = arith.constant 0 : i32
    %c0_i32_0 = arith.constant 0 : i32
    %c0_i32_1 = arith.constant 0 : i32
    return %c0_i32, %c0_i32_0 : i32, i32
  }
  func.func @transform_11(%arg0: i32) -> (i32, i32) {
    %c0_i32 = arith.constant 0 : i32
    %c0_i32_0 = arith.constant 0 : i32
    %c0_i32_1 = arith.constant 0 : i32
    return %c0_i32, %c0_i32_0 : i32, i32
  }
  func.func @transform_12(%arg0: i32) -> (i32, i32) {
    %c0_i32 = arith.constant 0 : i32
    %c0_i32_0 = arith.constant 0 : i32
    %c0_i32_1 = arith.constant 0 : i32
    return %c0_i32, %c0_i32_0 : i32, i32
  }
  func.func @transform_13(%arg0: i32) -> (i32, i32) {
    %c0_i32 = arith.constant 0 : i32
    %c0_i32_0 = arith.constant 0 : i32
    return %arg0, %c0_i32 : i32, i32
  }
}

</mosaic_0001>

<bundles_post_ra>
// kernel: mynetwork_forward.1
= control target key start
LH: loop header
LB: loop body
LE: loop exit
PB: predicated region body
PF: predicated region fallthrough
CT: control target
= control target key end

     0   :  { %s3262_s25 = smov 0   ;;  %s3264_s26 = smov 0   ;;  %s3865_s0 = inlined_call_operand.vmem [shape: f32[32,16,128], index: 0, kind: input, shape index: {}]   ;;  %s3866_s1 = inlined_call_operand.vmem [shape: bf16[384,128], index: 1, kind: input, shape index: {}]   ;;  %s3867_s2 = inlined_call_operand.vmem [shape: f32[1,128], index: 2, kind: input, shape index: {}]   ;;  %s3868_s3 = inlined_call_operand.vmem [shape: bf16[384,128], index: 3, kind: input, shape index: {}]   ;;  %s3869_s4 = inlined_call_operand.vmem [shape: f32[1,128], index: 4, kind: input, shape index: {}]   ;;  %s3870_s5 = inlined_call_operand.vmem [shape: bf16[384,128], index: 5, kind: input, shape index: {}]   ;;  %s3871_s6 = inlined_call_operand.vmem [shape: f32[1,128], index: 6, kind: input, shape index: {}]   ;;  %s3872_s7 = inlined_call_operand.vmem [shape: bf16[512,128], index: 7, kind: input, shape index: {}]   ;;  %s3873_s8 = inlined_call_operand.vmem [shape: f32[1,128], index: 8, kind: input, shape index: {}]   ;;  %s3874_s9 = inlined_call_operand.vmem [shape: bf16[128,256], index: 9, kind: input, shape index: {}]   ;;  %s3875_s10 = inlined_call_operand.vmem [shape: f32[1,256], index: 10, kind: input, shape index: {}]   ;;  %s3876_s11 = inlined_call_operand.vmem [shape: bf16[256,128], index: 11, kind: input, shape index: {}]   ;;  %s3877_s12 = inlined_call_operand.vmem [shape: f32[1,128], index: 12, kind: input, shape index: {}]   ;;  %s3878_s13 = inlined_call_operand.vmem [shape: f32[16,128], index: 13, kind: output, shape index: {}]  }
   0x1   :  { %s3266_s27 = smov 0  }
   0x2 LB: > { %s2497_s28 = sadd.s32 4294967295, %s3188_s27   ;;  %s3279_s29 = sadd.s32 1, %s3188_s27   ;;  %s3188_s27 = sphi %s3266_s27, %s3881_s27   ;;  %s3184_s26 = sphi %s3264_s26, %s3880_s26   ;;  %s3180_s25 = sphi %s3262_s25, %s3879_s25  }
   0x3   : > { %s27_s30 = ssub.s32 %s3188_s27, %s3279_s29  ;;  %s30_s14 = sadd.s32 1, %s3184_s26 }
   0x4   : > { %p28_p0 = scmp.eq.s32.totalorder %s27_s30, 0  ;;  %p37_p1 = scmp.ne.s32.totalorder %s3184_s26, %s3180_s25 }
   0x5   : > { %p38_p2 = scmp.eq.s32.totalorder %s3188_s27, 0  ;;  %p2500_p4 = scmp.ge.s32.totalorder %s3188_s27, 2 }
   0x6   : > { %s3288_s15 = scalar_select %p28_p0, %s3184_s26, %s30_s14  }
   0x7   : > { %p39_p3 = por %p38_p2, %p37_p1  ;;  %377 = sbr.rel (%p2500_p4) target bundleno = 32 (0x20), region = 64 }
   0xc   : > { %380 = sbr.rel (!%p39_p3) target bundleno = 32 (0x20), region = 68  ;;  %s382_s16 = sand.u32 (%p39_p3), 1, %s3184_s26  }
   0xd   : > { %s2502_s17 = sshll.u32 (%p39_p3), %s3188_s27, 3  ;;  %s2501_s18 = sshll.u32 (%p39_p3), %s382_s16, 8 }
   0xe   : > { %s3296_s21 = scalar_lea.vmem (%p39_p3), %s3865_s0, %s2502_s17  ;;  %s3301_s22 = scalar_lea.vmem (%p39_p3), [#allocation2], %s2501_s18 }
   0xf   : > { %v477_v0 = vld [vmem:[%s3296_s21] sm:$0xff] (%p39_p3)  ;;  %v479_v1 = vld [vmem:[%s3296_s21 + $0x10] sm:$0xff] (%p39_p3) }
  0x10   : > { %v481_v2 = vld [vmem:[%s3296_s21 + $0x20] sm:$0xff] (%p39_p3)  ;;  %478 = vst [vmem:[%s3301_s22] sm:$0xff] (%p39_p3), %v477_v0  ;;  %480 = vst [vmem:[%s3301_s22 + $0x8] sm:$0xff] (%p39_p3), %v479_v1  ;;  %v483_v3 = vld [vmem:[%s3296_s21 + $0x30] sm:$0xff] (%p39_p3) }
  0x11   : > { %482 = vst [vmem:[%s3301_s22 + $0x10] sm:$0xff] %v481_v2  ;;  %v485_v4 = vld [vmem:[%s3296_s21 + $0x40] sm:$0xff]  ;;  %v487_v5 = vld [vmem:[%s3296_s21 + $0x50] sm:$0xff]  ;;  %484 = vst [vmem:[%s3301_s22 + $0x18] sm:$0xff] %v483_v3 }
  0x12   : > { %486 = vst [vmem:[%s3301_s22 + $0x20] sm:$0xff] %v485_v4  ;;  %488 = vst [vmem:[%s3301_s22 + $0x28] sm:$0xff] %v487_v5  ;;  %v489_v6 = vld [vmem:[%s3296_s21 + $0x60] sm:$0xff]  ;;  %v491_v7 = vld [vmem:[%s3296_s21 + $0x70] sm:$0xff] }
  0x13   : > { %v493_v8 = vld [vmem:[%s3296_s21 + $0x80] sm:$0xff]  ;;  %490 = vst [vmem:[%s3301_s22 + $0x30] sm:$0xff] %v489_v6  ;;  %492 = vst [vmem:[%s3301_s22 + $0x38] sm:$0xff] %v491_v7  ;;  %v495_v9 = vld [vmem:[%s3296_s21 + $0x90] sm:$0xff] }
  0x14   : > { %494 = vst [vmem:[%s3301_s22 + $0x40] sm:$0xff] %v493_v8  ;;  %v497_v10 = vld [vmem:[%s3296_s21 + $0xa0] sm:$0xff]  ;;  %v499_v11 = vld [vmem:[%s3296_s21 + $0xb0] sm:$0xff]  ;;  %496 = vst [vmem:[%s3301_s22 + $0x48] sm:$0xff] %v495_v9 }
  0x15   : > { %498 = vst [vmem:[%s3301_s22 + $0x50] sm:$0xff] %v497_v10  ;;  %500 = vst [vmem:[%s3301_s22 + $0x58] sm:$0xff] %v499_v11  ;;  %v501_v12 = vld [vmem:[%s3296_s21 + $0xc0] sm:$0xff]  ;;  %v503_v13 = vld [vmem:[%s3296_s21 + $0xd0] sm:$0xff] }
  0x16   : > { %v505_v14 = vld [vmem:[%s3296_s21 + $0xe0] sm:$0xff]  ;;  %502 = vst [vmem:[%s3301_s22 + $0x60] sm:$0xff] %v501_v12  ;;  %504 = vst [vmem:[%s3301_s22 + $0x68] sm:$0xff] %v503_v13  ;;  %v507_v15 = vld [vmem:[%s3296_s21 + $0xf0] sm:$0xff] }
  0x17   : > { %506 = vst [vmem:[%s3301_s22 + $0x70] sm:$0xff] %v505_v14  ;;  %v509_v16 = vld [vmem:[%s3296_s21 + $0x100] sm:$0xff]  ;;  %v511_v17 = vld [vmem:[%s3296_s21 + $0x110] sm:$0xff]  ;;  %508 = vst [vmem:[%s3301_s22 + $0x78] sm:$0xff] %v507_v15 }
  0x18   : > { %510 = vst [vmem:[%s3301_s22 + $0x80] sm:$0xff] %v509_v16  ;;  %512 = vst [vmem:[%s3301_s22 + $0x88] sm:$0xff] %v511_v17  ;;  %v513_v18 = vld [vmem:[%s3296_s21 + $0x120] sm:$0xff]  ;;  %v515_v19 = vld [vmem:[%s3296_s21 + $0x130] sm:$0xff] }
  0x19   : > { %v517_v20 = vld [vmem:[%s3296_s21 + $0x140] sm:$0xff]  ;;  %514 = vst [vmem:[%s3301_s22 + $0x90] sm:$0xff] %v513_v18  ;;  %516 = vst [vmem:[%s3301_s22 + $0x98] sm:$0xff] %v515_v19  ;;  %v519_v21 = vld [vmem:[%s3296_s21 + $0x150] sm:$0xff] }
  0x1a   : > { %518 = vst [vmem:[%s3301_s22 + $0xa0] sm:$0xff] %v517_v20  ;;  %v521_v22 = vld [vmem:[%s3296_s21 + $0x160] sm:$0xff]  ;;  %v523_v23 = vld [vmem:[%s3296_s21 + $0x170] sm:$0xff]  ;;  %520 = vst [vmem:[%s3301_s22 + $0xa8] sm:$0xff] %v519_v21 }
  0x1b   : > { %522 = vst [vmem:[%s3301_s22 + $0xb0] sm:$0xff] %v521_v22  ;;  %524 = vst [vmem:[%s3301_s22 + $0xb8] sm:$0xff] %v523_v23  ;;  %v525_v24 = vld [vmem:[%s3296_s21 + $0x180] sm:$0xff]  ;;  %v527_v25 = vld [vmem:[%s3296_s21 + $0x190] sm:$0xff] }
  0x1c   : > { %v529_v26 = vld [vmem:[%s3296_s21 + $0x1a0] sm:$0xff]  ;;  %526 = vst [vmem:[%s3301_s22 + $0xc0] sm:$0xff] %v525_v24  ;;  %528 = vst [vmem:[%s3301_s22 + $0xc8] sm:$0xff] %v527_v25  ;;  %v531_v27 = vld [vmem:[%s3296_s21 + $0x1b0] sm:$0xff] }
  0x1d   : > { %530 = vst [vmem:[%s3301_s22 + $0xd0] sm:$0xff] %v529_v26  ;;  %v533_v28 = vld [vmem:[%s3296_s21 + $0x1c0] sm:$0xff]  ;;  %v535_v29 = vld [vmem:[%s3296_s21 + $0x1d0] sm:$0xff]  ;;  %532 = vst [vmem:[%s3301_s22 + $0xd8] sm:$0xff] %v531_v27 }
  0x1e   : > { %534 = vst [vmem:[%s3301_s22 + $0xe0] sm:$0xff] %v533_v28  ;;  %536 = vst [vmem:[%s3301_s22 + $0xe8] sm:$0xff] %v535_v29  ;;  %v537_v30 = vld [vmem:[%s3296_s21 + $0x1e0] sm:$0xff]  ;;  %v539_v31 = vld [vmem:[%s3296_s21 + $0x1f0] sm:$0xff] }
  0x1f   : > { %538 = vst [vmem:[%s3301_s22 + $0xf0] sm:$0xff] %v537_v30  ;;  %540 = vst [vmem:[%s3301_s22 + $0xf8] sm:$0xff] %v539_v31 }
  0x20 PF: > { %p2503_p5 = scmp.ge.s32.totalorder %s3188_s27, 1  ;;  %p545_p6 = scmp.lt.s32.totalorder %s3188_s27, 3 }
  0x22   : > { %p546_p7 = pnand %p2503_p5, %p545_p6 }
  0x23   : > { %s552_s18 = sand.u32 (!%p546_p7), 1, %s3180_s25   ;;  %p594_p8 = scmp.lt.s32.totalorder (!%p546_p7), %s2497_s28, 1 }
  0x24   : > { %549 = sbr.rel (%p546_p7) target bundleno = 1669 (0x685), region = 106  ;;  %s2504_s23 = sshll.u32 (!%p546_p7), %s552_s18, 8 }
  0x25   : > { %s3430_s22 = scalar_lea.vmem (!%p546_p7), [#allocation2], %s2504_s23 }
  0x29   : > { %v3018_v32 = vld [vmem:[%s3866_s1 + $0x78] sm:$0xff]   ;;  %v3020_v34 = vld [vmem:[%s3866_s1 + $0x70] sm:$0xff]   ;;  %v3023_v37 = vld [vmem:[%s3866_s1 + $0x68] sm:$0xff]   ;;  %v3190_v0 = vmov 0.0   ;;  %s3883_s28 = smov (!%p594_p8, %s2497_s28), 1 }
  0x2a   : > { %v3019_v33 = vld [vmem:[%s3866_s1 + $0x38] sm:$0xff]   ;;  %2680 = vmatprep.subr.bf16.mxu0 %v3018_v32  ;;  %v3022_v36 = vld [vmem:[%s3866_s1 + $0x30] sm:$0xff]   ;;  %v3025_v39 = vld [vmem:[%s3866_s1 + $0x28] sm:$0xff]   ;;  %s2505_s25 = sshll.u32 %s3883_s28, 3 }
  0x2b   : > { %2681 = vmatpush3.bf16.msra.mxu0 %v3019_v33  ;;  %v3021_v35 = vld [vmem:[%s3866_s1 + $0xb8] sm:$0xff]   ;;  %v3024_v38 = vld [vmem:[%s3866_s1 + $0xb0] sm:$0xff]   ;;  %v3026_v40 = vld [vmem:[%s3866_s1 + $0x60] sm:$0xff]   ;;  %s597_s17 = scalar_lea.vmem %s3878_s13, %s2505_s25 }
  0x2c   : > { %2682 = vmatprep.subr.bf16.mxu0 %v3020_v34  ;;  %2916 = vmatprep.subr.bf16.mxu1 %v3021_v35  ;;  %v3027_v41 = vld [vmem:[%s3866_s1 + $0xa8] sm:$0xff]   ;;  %v3028_v42 = vld [vmem:[%s3866_s1 + $0x20] sm:$0xff]   ;;  %v3029_v43 = vld [vmem:[%s3866_s1 + $0x58] sm:$0xff]  }
  0x2d   : > { %2917 = vmatpush3.bf16.msra.mxu1 %v3021_v35  ;;  %v3030_v44 = vld [vmem:[%s3866_s1 + $0xa0] sm:$0xff]   ;;  %v3031_v45 = vld [vmem:[%s3866_s1 + $0x18] sm:$0xff]   ;;  %v3032_v47 = vld [vmem:[%s3866_s1 + $0x50] sm:$0xff]  }
  0x2e   : > { %2918 = vmatprep.subr.bf16.mxu1 %v3024_v38  ;;  %v3033_v46 = vld [vmem:[%s3866_s1 + $0x98] sm:$0xff]   ;;  %v3034_v48 = vld [vmem:[%s3866_s1 + $0x10] sm:$0xff]   ;;  %v3035_v50 = vld [vmem:[%s3866_s1 + $0x48] sm:$0xff]  }
  0x2f   : > { %2683 = vmatpush3.bf16.msra.mxu0 %v3022_v36  ;;  %v3036_v49 = vld [vmem:[%s3866_s1 + $0x90] sm:$0xff]   ;;  %v3037_v51 = vld [vmem:[%s3866_s1 + $0x8] sm:$0xff]   ;;  %v599_v53 = vld [vmem:[%s3430_s22] sm:$0xff] }
  0x30   : > { %2684 = vmatprep.subr.bf16.mxu0 %v3023_v37  ;;  %v3039_v52 = vld [vmem:[%s3866_s1 + $0x88] sm:$0xff]   ;;  %v2507_v54 = vld [vmem:[%s3430_s22 + $0x10] sm:$0xff]  ;;  %v3038_v55 = vld [vmem:[%s3866_s1 + $0x40] sm:$0xff]  }
  0x31   : > { %2919 = vmatpush3.bf16.msra.mxu1 %v3024_v38  ;;  %v663_v56 = vpack.c.bf16 %v2507_v54, %v599_v53  ;;  %v2506_v57 = vld [vmem:[%s3430_s22 + $0x8] sm:$0xff]  ;;  %v2508_v58 = vld [vmem:[%s3430_s22 + $0x18] sm:$0xff]  ;;  %v3040_v60 = vld [vmem:[%s3866_s1] sm:$0xff]  }
  0x32   : > { %2920 = vmatprep.subr.bf16.mxu1 %v3027_v41  ;;  %v664_v59 = vpack.c.bf16 %v2508_v58, %v2506_v57  ;;  %v3041_v61 = vld [vmem:[%s3866_s1 + $0x80] sm:$0xff]   ;;  %v2511_v63 = vld [vmem:[%s3430_s22 + $0x30] sm:$0xff]  ;;  %v662_v1 = vpack.c.bf16 %v2506_v57, %v3190_v0  ;;  %v2510_v2 = vld [vmem:[%s3430_s22 + $0x28] sm:$0xff] }
  0x33   : > { %2685 = vmatpush3.bf16.msra.mxu0 %v3025_v39  ;;  %917 = vmatprep.mubr.bf16.mxu0 %v663_v56  ;;  %v2509_v62 = vld [vmem:[%s3430_s22 + $0x20] sm:$0xff]  ;;  %v2512_v3 = vld [vmem:[%s3430_s22 + $0x38] sm:$0xff]  ;;  %v2514_v7 = vld [vmem:[%s3430_s22 + $0x48] sm:$0xff]  ;;  %v665_v17 = vpack.c.bf16 %v2510_v2, %v2508_v58 }
  0x34   : > { %2686 = vmatprep.subr.bf16.mxu0 %v3026_v40  ;;  %2932 = vmatprep.mubr.bf16.mxu1 %v664_v59  ;;  %v666_v4 = vpack.c.bf16 %v2511_v63, %v2509_v62  ;;  %v2516_v5 = vld [vmem:[%s3430_s22 + $0x58] sm:$0xff]  ;;  %v667_v6 = vpack.c.bf16 %v2512_v3, %v2510_v2  ;;  %v2513_v8 = vld [vmem:[%s3430_s22 + $0x40] sm:$0xff]  ;;  %v2515_v9 = vld [vmem:[%s3430_s22 + $0x50] sm:$0xff]  ;;  %v668_v30 = vpack.c.bf16 %v2514_v7, %v2512_v3 }
  0x35   : > { %2921 = vmatpush3.bf16.msra.mxu1 %v3027_v41  ;;  %v670_v10 = vpack.c.bf16 %v2516_v5, %v2514_v7  ;;  %v3042_v11 = vld [vmem:[%s3868_s3 + $0x78] sm:$0xff]   ;;  %v2518_v12 = vld [vmem:[%s3430_s22 + $0x68] sm:$0xff]  ;;  %v3044_v16 = vld [vmem:[%s3868_s3 + $0x70] sm:$0xff]   ;;  %v669_v19 = vpack.c.bf16 %v2515_v9, %v2513_v8 }
  0x36   : > { %2922 = vmatprep.subr.bf16.mxu1 %v3030_v44  ;;  %v2520_v13 = vld [vmem:[%s3430_s22 + $0x78] sm:$0xff]  ;;  %v3045_v18 = vld [vmem:[%s3868_s3 + $0x30] sm:$0xff]   ;;  %v2522_v20 = vld [vmem:[%s3430_s22 + $0x88] sm:$0xff]  ;;  %v671_v39 = vpack.c.bf16 %v2518_v12, %v2516_v5 }
  0x37   : > { %2687 = vmatpush3.bf16.msra.mxu0 %v3028_v42  ;;  %v3043_v14 = vld [vmem:[%s3868_s3 + $0x38] sm:$0xff]   ;;  %v3046_v21 = vld [vmem:[%s3868_s3 + $0x68] sm:$0xff]   ;;  %v673_v23 = vpack.c.bf16 %v2520_v13, %v2518_v12  ;;  %v2517_v24 = vld [vmem:[%s3430_s22 + $0x60] sm:$0xff] }
  0x38   : > { %2688 = vmatprep.subr.bf16.mxu0 %v3029_v43  ;;  %v2524_v15 = vld [vmem:[%s3430_s22 + $0x98] sm:$0xff]  ;;  %v3047_v22 = vld [vmem:[%s3868_s3 + $0x28] sm:$0xff]   ;;  %v2519_v25 = vld [vmem:[%s3430_s22 + $0x70] sm:$0xff] }
  0x39   : > { %2923 = vmatpush3.bf16.msra.mxu1 %v3030_v44  ;;  %v676_v26 = vpack.c.bf16 %v2524_v15, %v2522_v20  ;;  %v2526_v27 = vld [vmem:[%s3430_s22 + $0xa8] sm:$0xff]  ;;  %v2528_v28 = vld [vmem:[%s3430_s22 + $0xb8] sm:$0xff]  ;;  %v672_v31 = vpack.c.bf16 %v2519_v25, %v2517_v24  ;;  %v2521_v34 = vld [vmem:[%s3430_s22 + $0x80] sm:$0xff]  ;;  %v674_v44 = vpack.c.bf16 %v2522_v20, %v2520_v13 }
  0x3a   : > { %2924 = vmatprep.subr.bf16.mxu1 %v3033_v46  ;;  %v2532_v29 = vld [vmem:[%s3430_s22 + $0xd8] sm:$0xff]  ;;  %v2530_v32 = vld [vmem:[%s3430_s22 + $0xc8] sm:$0xff]  ;;  %v679_v33 = vpack.c.bf16 %v2528_v28, %v2526_v27  ;;  %v2523_v35 = vld [vmem:[%s3430_s22 + $0x90] sm:$0xff] }
  0x3b   : > { %2689 = vmatpush3.bf16.msra.mxu0 %v3031_v45  ;;  %v682_v36 = vpack.c.bf16 %v2532_v29, %v2530_v32  ;;  %v2534_v37 = vld [vmem:[%s3430_s22 + $0xe8] sm:$0xff]  ;;  %v2536_v38 = vld [vmem:[%s3430_s22 + $0xf8] sm:$0xff]  ;;  %v675_v40 = vpack.c.bf16 %v2523_v35, %v2521_v34  ;;  %v2525_v42 = vld [vmem:[%s3430_s22 + $0xa0] sm:$0xff] }
  0x3c   : > { %2690 = vmatprep.subr.bf16.mxu0 %v3032_v47  ;;  %v685_v41 = vpack.c.bf16 %v2536_v38, %v2534_v37  ;;  %v2527_v43 = vld [vmem:[%s3430_s22 + $0xb0] sm:$0xff]  ;;  %v683_v54 = vpack.c.bf16 %v2534_v37, %v2532_v29  ;;  %v3049_v56 = vld [vmem:[%s3868_s3 + $0x60] sm:$0xff]   ;;  %v3051_v58 = vld [vmem:[%s3868_s3 + $0x58] sm:$0xff]  }
  0x3d   : > { %2925 = vmatpush3.bf16.msra.mxu1 %v3033_v46  ;;  %v678_v45 = vpack.c.bf16 %v2527_v43, %v2525_v42  ;;  %v2529_v46 = vld [vmem:[%s3430_s22 + $0xc0] sm:$0xff]  ;;  %v2531_v47 = vld [vmem:[%s3430_s22 + $0xd0] sm:$0xff]  ;;  %v3052_v59 = vld [vmem:[%s3868_s3 + $0x18] sm:$0xff]  }
  0x3e   : > { %2926 = vmatprep.subr.bf16.mxu1 %v3036_v49  ;;  %v3050_v57 = vld [vmem:[%s3868_s3 + $0x20] sm:$0xff]   ;;  %v3055_v62 = vld [vmem:[%s3868_s3 + $0x10] sm:$0xff]   ;;  %v3056_v63 = vld [vmem:[%s3868_s3 + $0x48] sm:$0xff]  }
  0x3f   : > { %2691 = vmatpush3.bf16.msra.mxu0 %v3034_v48  ;;  %v677_v48 = vpack.c.bf16 %v2526_v27, %v2524_v15  ;;  %v3058_v2 = vld [vmem:[%s3868_s3 + $0xa8] sm:$0xff]   ;;  %v3059_v3 = vld [vmem:[%s3868_s3 + $0x40] sm:$0xff]   ;;  %v3063_v7 = vld [vmem:[%s3868_s3 + $0x90] sm:$0xff]  }
  0x40   : > { %2692 = vmatprep.subr.bf16.mxu0 %v3035_v50  ;;  %v2533_v50 = vld [vmem:[%s3430_s22 + $0xe0] sm:$0xff]  ;;  %v3064_v8 = vld [vmem:[%s3868_s3 + $0x88] sm:$0xff]  }
  0x41   : > { %2927 = vmatpush3.bf16.msra.mxu1 %v3036_v49  ;;  %v681_v49 = vpack.c.bf16 %v2531_v47, %v2529_v46  ;;  %v3061_v5 = vld [vmem:[%s3868_s3 + $0xa0] sm:$0xff]  }
  0x42   : > { %2928 = vmatprep.subr.bf16.mxu1 %v3039_v52  ;;  %v3065_v9 = vld [vmem:[%s3868_s3 + $0x80] sm:$0xff]  }
  0x43   : > { %2693 = vmatpush3.bf16.msra.mxu0 %v3037_v51  ;;  %v2535_v51 = vld [vmem:[%s3430_s22 + $0xf0] sm:$0xff] }
  0x44   : > { %2694 = vmatprep.subr.bf16.mxu0 %v3038_v55  ;;  %v684_v53 = vpack.c.bf16 %v2535_v51, %v2533_v50  ;;  %v3048_v55 = vld [vmem:[%s3868_s3 + $0xb8] sm:$0xff]  }
  0x45   : > { %2929 = vmatpush3.bf16.msra.mxu1 %v3039_v52  ;;  %v680_v52 = vpack.c.bf16 %v2530_v32, %v2528_v28 }
  0x46   : > { %2930 = vmatprep.subr.bf16.mxu1 %v3041_v61 }
  0x47   : > { %2695 = vmatpush3.bf16.msra.mxu0 %v3040_v60  ;;  %v3054_v60 = vld [vmem:[%s3868_s3 + $0x50] sm:$0xff]  }
  0x48   : > { %2948 = vmatprep.subr.bf16.mxu0 %v3048_v55 }
  0x49   : > { %2931 = vmatpush3.bf16.msra.mxu1 %v3041_v61  ;;  %v3053_v61 = vld [vmem:[%s3868_s3 + $0xb0] sm:$0xff]  }
  0x4a   : > { %918 = vmatmul.mubr.bf16.vlgmr.msra.gmra.mxu0 %v662_v1  ;;  %2760 = vmatprep.subr.bf16.mxu1 %v3042_v11  ;;  %v3057_v1 = vld [vmem:[%s3868_s3 + $0x8] sm:$0xff]  }
  0x4b   : > { %925 = vmatprep.mubr.bf16.mxu0 %v666_v4  ;;  %2949 = vmatpush3.bf16.msra.mxu0 %v3048_v55  ;;  %v3060_v4 = vld [vmem:[%s3868_s3] sm:$0xff]  }
  0x4c   : > { %2933 = vmatmul.mubr.bf16.vlgmr.msra.gmra.mxu1 %v667_v6  ;;  %2950 = vmatprep.subr.bf16.mxu0 %v3053_v61  ;;  %v3062_v6 = vld [vmem:[%s3868_s3 + $0x98] sm:$0xff]  }
  0x4d   : > { %2936 = vmatprep.mubr.bf16.mxu1 %v670_v10  ;;  %2761 = vmatpush3.bf16.msra.mxu1 %v3043_v14 }
  0x4e   : > { %2762 = vmatprep.subr.bf16.mxu1 %v3044_v16 }
  0x4f   : > { %2951 = vmatpush3.bf16.msra.mxu0 %v3053_v61 }
  0x50   : > { %2952 = vmatprep.subr.bf16.mxu0 %v3058_v2 }
  0x51   : > { %2763 = vmatpush3.bf16.msra.mxu1 %v3045_v18 }
  0x52   : > { %926 = vmatmul.mubr.bf16.gmra.mxu0 %v665_v17  ;;  %2764 = vmatprep.subr.bf16.mxu1 %v3046_v21  ;;  %v3549_v17 = vld [vmem:[%s3867_s2] ss:$0 sm:$0xff] }
  0x53   : > { %933 = vmatprep.mubr.bf16.mxu0 %v669_v19  ;;  %2953 = vmatpush3.bf16.msra.mxu0 %v3058_v2 }
  0x54   : > { %2937 = vmatmul.mubr.bf16.gmra.mxu1 %v673_v23  ;;  %2954 = vmatprep.subr.bf16.mxu0 %v3061_v5 }
  0x55   : > { %2940 = vmatprep.mubr.bf16.mxu1 %v676_v26  ;;  %2765 = vmatpush3.bf16.msra.mxu1 %v3047_v22 }
  0x56   : > { %2766 = vmatprep.subr.bf16.mxu1 %v3049_v56 }
  0x57   : > { %2955 = vmatpush3.bf16.msra.mxu0 %v3061_v5 }
  0x58   : > { %2956 = vmatprep.subr.bf16.mxu0 %v3062_v6 }
  0x59   : > { %2767 = vmatpush3.bf16.msra.mxu1 %v3050_v57 }
  0x5a   : > { %934 = vmatmul.mubr.bf16.gmra.mxu0 %v668_v30  ;;  %2768 = vmatprep.subr.bf16.mxu1 %v3051_v58 }
  0x5b   : > { %941 = vmatprep.mubr.bf16.mxu0 %v672_v31  ;;  %2957 = vmatpush3.bf16.msra.mxu0 %v3062_v6 }
  0x5c   : > { %2941 = vmatmul.mubr.bf16.gmra.mxu1 %v679_v33  ;;  %2958 = vmatprep.subr.bf16.mxu0 %v3063_v7 }
  0x5d   : > { %2944 = vmatprep.mubr.bf16.mxu1 %v682_v36  ;;  %2769 = vmatpush3.bf16.msra.mxu1 %v3052_v59 }
  0x5e   : > { %2770 = vmatprep.subr.bf16.mxu1 %v3054_v60 }
  0x5f   : > { %2959 = vmatpush3.bf16.msra.mxu0 %v3063_v7 }
  0x60   : > { %2960 = vmatprep.subr.bf16.mxu0 %v3064_v8 }
  0x61   : > { %2771 = vmatpush3.bf16.msra.mxu1 %v3055_v62 }
  0x62   : > { %942 = vmatmul.mubr.bf16.gmra.mxu0 %v671_v39  ;;  %2772 = vmatprep.subr.bf16.mxu1 %v3056_v63 }
  0x63   : > { %949 = vmatprep.mubr.bf16.mxu0 %v675_v40  ;;  %2961 = vmatpush3.bf16.msra.mxu0 %v3064_v8 }
  0x64   : > { %2945 = vmatmul.mubr.bf16.gmra.mxu1 %v685_v41  ;;  %2962 = vmatprep.subr.bf16.mxu0 %v3065_v9 }
  0x65   : > { %2773 = vmatpush3.bf16.msra.mxu1 %v3057_v1 }
  0x66   : > { %2774 = vmatprep.subr.bf16.mxu1 %v3059_v3 }
  0x67   : > { %2963 = vmatpush3.bf16.msra.mxu0 %v3065_v9 }
  0x69   : > { %2775 = vmatpush3.bf16.msra.mxu1 %v3060_v4 }
  0x6a   : > { %950 = vmatmul.mubr.bf16.gmra.mxu0 %v674_v44 }
  0x6b   : > { %957 = vmatprep.mubr.bf16.mxu0 %v678_v45 }
  0x72   : > { %958 = vmatmul.mubr.bf16.gmra.mxu0 %v677_v48 }
  0x73   : > { %965 = vmatprep.mubr.bf16.mxu0 %v681_v49 }
  0x7a   : > { %966 = vmatmul.mubr.bf16.gmra.mxu0 %v680_v52 }
  0x7b   : > { %973 = vmatprep.mubr.bf16.mxu0 %v684_v53 }
  0x82   : > { %974 = vmatmul.mubr.bf16.gmra.mxu0 %v683_v54 }
 0x10a   : > { %v2696_v10 = vpop.f32.mrf.mxu0 }
 0x10c   : > { %v2697_v11 = vpop.f32.mrf.mxu0  ;;  %v2934_v12 = vpop.f32.mrf.mxu1 }
 0x10d   : > { %v2698_v14 = vadd.f32 %v2697_v11, %v2696_v10 }
 0x10e   : > { %v2699_v13 = vpop.f32.mrf.mxu0  ;;  %v1016_v15 = vpop.f32.mrf.mxu1 }
 0x10f   : > { %v920_v21 = vadd.f32 %v2698_v14, %v3549_v17 }
 0x110   : > { %v2700_v16 = vpop.f32.mrf.mxu0  ;;  %v2935_v19 = vpop.f32.mrf.mxu1 }
 0x111   : > { %v2701_v18 = vadd.f32 %v2700_v16, %v2699_v13  ;;  %v1017_v28 = vadd.f32 %v1016_v15, %v920_v21 }
 0x112   : > { %v2702_v20 = vpop.f32.mrf.mxu0  ;;  %v1019_v23 = vpop.f32.mrf.mxu1 }
 0x113   : > { %v923_v22 = vadd.f32 %v2701_v18, %v3549_v17  ;;  %v1079_v36 = vmax.f32 %v1017_v28, 0.0 }
 0x114   : > { %v2703_v24 = vpop.f32.mrf.mxu0  ;;  %v2938_v30 = vpop.f32.mrf.mxu1 }
 0x115   : > { %v2704_v25 = vadd.f32 %v2703_v24, %v2702_v20  ;;  %v1020_v26 = vadd.f32 %v1019_v23, %v923_v22 }
 0x116   : > { %v2705_v27 = vpop.f32.mrf.mxu0  ;;  %v1032_v39 = vpop.f32.mrf.mxu1 }
 0x117   : > { %v928_v29 = vadd.f32 %v2704_v25, %v3549_v17  ;;  %v1080_v34 = vmax.f32 %v1020_v26, 0.0 }
 0x118   : > { %v2706_v31 = vpop.f32.mrf.mxu0  ;;  %v2939_v47 = vpop.f32.mrf.mxu1 }
 0x119   : > { %v1025_v32 = vadd.f32 %v2934_v12, %v928_v29  ;;  %v2707_v33 = vadd.f32 %v2706_v31, %v2705_v27  ;;  %v1095_v43 = vpack.c.bf16 %v1080_v34, %v3190_v0 }
 0x11a   : > { %v2708_v35 = vpop.f32.mrf.mxu0  ;;  %v1035_v54 = vpop.f32.mrf.mxu1 }
 0x11b   : > { %v1081_v37 = vmax.f32 %v1025_v32, 0.0  ;;  %v931_v38 = vadd.f32 %v2707_v33, %v3549_v17 }
 0x11c   : > { %v2709_v40 = vpop.f32.mrf.mxu0  ;;  %v2942_v61 = vpop.f32.mrf.mxu1 }
 0x11d   : > { %v1028_v41 = vadd.f32 %v2935_v19, %v931_v38  ;;  %v1096_v42 = vpack.c.bf16 %v1081_v37, %v1079_v36  ;;  %v2710_v46 = vadd.f32 %v2709_v40, %v2708_v35 }
 0x11e   : > { %v2711_v44 = vpop.f32.mrf.mxu0  ;;  %v1048_v7 = vpop.f32.mrf.mxu1 }
 0x11f   : > { %v1082_v45 = vmax.f32 %v1028_v41, 0.0  ;;  %1338 = vmatprep.mubr.bf16.mxu1 %v1096_v42  ;;  %v936_v52 = vadd.f32 %v2710_v46, %v3549_v17 }
 0x120   : > { %v2712_v48 = vpop.f32.mrf.mxu0  ;;  %1339 = vmatmul.mubr.bf16.vlgmr.msra.gmra.mxu1 %v1095_v43  ;;  %v2943_v15 = vpop.f32.mrf.mxu1 }
 0x121   : > { %v2713_v49 = vadd.f32 %v2712_v48, %v2711_v44  ;;  %v1097_v50 = vpack.c.bf16 %v1082_v45, %v1080_v34  ;;  %v1033_v59 = vadd.f32 %v1032_v39, %v936_v52 }
 0x122   : > { %v2714_v51 = vpop.f32.mrf.mxu0  ;;  %v1051_v23 = vpop.f32.mrf.mxu1 }
 0x123   : > { %2964 = vmatprep.mubr.bf16.mxu0 %v1097_v50  ;;  %v939_v53 = vadd.f32 %v2713_v49, %v3549_v17  ;;  %v1083_v4 = vmax.f32 %v1033_v59, 0.0 }
 0x124   : > { %v2715_v55 = vpop.f32.mrf.mxu0 }
 0x125   : > { %v2716_v56 = vadd.f32 %v2715_v55, %v2714_v51  ;;  %v1036_v57 = vadd.f32 %v1035_v54, %v939_v53 }
 0x126   : > { %v2717_v58 = vpop.f32.mrf.mxu0 }
 0x127   : > { %v944_v60 = vadd.f32 %v2716_v56, %v3549_v17  ;;  %v1084_v2 = vmax.f32 %v1036_v57, 0.0 }
 0x128   : > { %v2718_v62 = vpop.f32.mrf.mxu0 }
 0x129   : > { %v1041_v63 = vadd.f32 %v2938_v30, %v944_v60  ;;  %v2719_v1 = vadd.f32 %v2718_v62, %v2717_v58  ;;  %v1098_v11 = vpack.c.bf16 %v1084_v2, %v1082_v45  ;;  %v2946_v30 = vpop.f32.mrf.mxu1 }
 0x12a   : > { %v2720_v3 = vpop.f32.mrf.mxu0 }
 0x12b   : > { %v1085_v5 = vmax.f32 %v1041_v63, 0.0  ;;  %v947_v6 = vadd.f32 %v2719_v1, %v3549_v17  ;;  %v1064_v39 = vpop.f32.mrf.mxu1 }
 0x12c   : > { %v2721_v8 = vpop.f32.mrf.mxu0 }
 0x12d   : > { %v1044_v9 = vadd.f32 %v2939_v47, %v947_v6  ;;  %v1099_v10 = vpack.c.bf16 %v1085_v5, %v1083_v4  ;;  %v2722_v14 = vadd.f32 %v2721_v8, %v2720_v3  ;;  %v2947_v47 = vpop.f32.mrf.mxu1 }
 0x12e   : > { %v2723_v12 = vpop.f32.mrf.mxu0 }
 0x12f   : > { %v1086_v13 = vmax.f32 %v1044_v9, 0.0  ;;  %1346 = vmatprep.mubr.bf16.mxu1 %v1099_v10  ;;  %v952_v21 = vadd.f32 %v2722_v14, %v3549_v17  ;;  %v1067_v54 = vpop.f32.mrf.mxu1  ;;  %v3066_v10 = vld [vmem:[%s3870_s5 + $0x78] sm:$0xff]   ;;  %v3071_v14 = vld [vmem:[%s3870_s5 + $0x28] sm:$0xff]  }
 0x130   : > { %v2724_v16 = vpop.f32.mrf.mxu0  ;;  %1347 = vmatmul.mubr.bf16.gmra.mxu1 %v1098_v11  ;;  %v3067_v11 = vld [vmem:[%s3870_s5 + $0x38] sm:$0xff]   ;;  %2812 = vmatprep.subr.bf16.mxu1 %v3066_v10 }
 0x131   : > { %v1100_v18 = vpack.c.bf16 %v1086_v13, %v1084_v2  ;;  %v2725_v19 = vadd.f32 %v2724_v16, %v2723_v12  ;;  %v1049_v28 = vadd.f32 %v1048_v7, %v952_v21  ;;  %2813 = vmatpush3.bf16.msra.mxu1 %v3067_v11  ;;  %v3069_v12 = vld [vmem:[%s3870_s5 + $0x30] sm:$0xff]   ;;  %v3073_v16 = vld [vmem:[%s3870_s5 + $0x20] sm:$0xff]  }
 0x132   : > { %v2726_v20 = vpop.f32.mrf.mxu0  ;;  %v3077_v21 = vld [vmem:[%s3870_s5 + $0x10] sm:$0xff]  }
 0x133   : > { %2965 = vmatmul.mubr.bf16.vlgmr.msra.gmra.mxu0 %v1100_v18  ;;  %v955_v22 = vadd.f32 %v2725_v19, %v3549_v17  ;;  %v1087_v36 = vmax.f32 %v1049_v28, 0.0  ;;  %v3074_v18 = vld [vmem:[%s3870_s5 + $0x58] sm:$0xff]   ;;  %v3084_v28 = vld [vmem:[%s3870_s5 + $0xa8] sm:$0xff]  }
 0x134   : > { %v2727_v24 = vpop.f32.mrf.mxu0  ;;  %v3075_v19 = vld [vmem:[%s3870_s5 + $0x18] sm:$0xff]  }
 0x135   : > { %v2728_v25 = vadd.f32 %v2727_v24, %v2726_v20  ;;  %v1052_v26 = vadd.f32 %v1051_v23, %v955_v22  ;;  %v3076_v20 = vld [vmem:[%s3870_s5 + $0x50] sm:$0xff]   ;;  %v3078_v22 = vld [vmem:[%s3870_s5 + $0x48] sm:$0xff]   ;;  %v3080_v24 = vld [vmem:[%s3870_s5 + $0x40] sm:$0xff]  }
 0x136   : > { %v2729_v27 = vpop.f32.mrf.mxu0  ;;  %v3079_v23 = vld [vmem:[%s3870_s5 + $0x8] sm:$0xff]  }
 0x137   : > { %v960_v29 = vadd.f32 %v2728_v25, %v3549_v17  ;;  %v1088_v34 = vmax.f32 %v1052_v26, 0.0  ;;  %v3081_v25 = vld [vmem:[%s3870_s5] sm:$0xff]   ;;  %v3082_v26 = vld [vmem:[%s3870_s5 + $0xb8] sm:$0xff]  }
 0x138   : > { %v2730_v31 = vpop.f32.mrf.mxu0  ;;  %2972 = vmatprep.subr.bf16.mxu0 %v3082_v26 }
 0x139   : > { %v1057_v32 = vadd.f32 %v2942_v61, %v960_v29  ;;  %v2731_v33 = vadd.f32 %v2730_v31, %v2729_v27  ;;  %v1101_v43 = vpack.c.bf16 %v1088_v34, %v1086_v13  ;;  %v3070_v13 = vld [vmem:[%s3870_s5 + $0x68] sm:$0xff]   ;;  %2973 = vmatpush3.bf16.msra.mxu0 %v3082_v26  ;;  %v3083_v27 = vld [vmem:[%s3870_s5 + $0xb0] sm:$0xff]   ;;  %v3085_v29 = vld [vmem:[%s3870_s5 + $0xa0] sm:$0xff]  }
 0x13a   : > { %v2732_v35 = vpop.f32.mrf.mxu0  ;;  %2974 = vmatprep.subr.bf16.mxu0 %v3083_v27  ;;  %v3087_v31 = vld [vmem:[%s3870_s5 + $0x90] sm:$0xff]  }
 0x13b   : > { %v1089_v37 = vmax.f32 %v1057_v32, 0.0  ;;  %v963_v38 = vadd.f32 %v2731_v33, %v3549_v17  ;;  %v3088_v32 = vld [vmem:[%s3870_s5 + $0x88] sm:$0xff]   ;;  %v3089_v33 = vld [vmem:[%s3870_s5 + $0x80] sm:$0xff]  }
 0x13c   : > { %v2733_v40 = vpop.f32.mrf.mxu0 }
 0x13d   : > { %v1060_v41 = vadd.f32 %v2943_v15, %v963_v38  ;;  %v1102_v42 = vpack.c.bf16 %v1089_v37, %v1087_v36  ;;  %v2734_v46 = vadd.f32 %v2733_v40, %v2732_v35  ;;  %v3072_v15 = vld [vmem:[%s3870_s5 + $0x60] sm:$0xff]   ;;  %2975 = vmatpush3.bf16.msra.mxu0 %v3083_v27 }
 0x13e   : > { %v2735_v44 = vpop.f32.mrf.mxu0  ;;  %2976 = vmatprep.subr.bf16.mxu0 %v3084_v28  ;;  %v2562_v40 = vld [vmem:[%s3869_s4] ss:$0 sm:$0xff] }
 0x13f   : > { %v1090_v45 = vmax.f32 %v1060_v41, 0.0  ;;  %1354 = vmatprep.mubr.bf16.mxu1 %v1102_v42  ;;  %v968_v52 = vadd.f32 %v2734_v46, %v3549_v17 }
 0x140   : > { %v2736_v48 = vpop.f32.mrf.mxu0  ;;  %1355 = vmatmul.mubr.bf16.gmra.mxu1 %v1101_v43 }
 0x141   : > { %v2737_v49 = vadd.f32 %v2736_v48, %v2735_v44  ;;  %v1103_v50 = vpack.c.bf16 %v1090_v45, %v1088_v34  ;;  %v1065_v59 = vadd.f32 %v1064_v39, %v968_v52  ;;  %2977 = vmatpush3.bf16.msra.mxu0 %v3084_v28 }
 0x142   : > { %v2738_v51 = vpop.f32.mrf.mxu0  ;;  %2978 = vmatprep.subr.bf16.mxu0 %v3085_v29 }
 0x143   : > { %2968 = vmatprep.mubr.bf16.mxu0 %v1103_v50  ;;  %v971_v53 = vadd.f32 %v2737_v49, %v3549_v17  ;;  %v1091_v2 = vmax.f32 %v1065_v59, 0.0 }
 0x144   : > { %v2739_v55 = vpop.f32.mrf.mxu0 }
 0x145   : > { %v2740_v56 = vadd.f32 %v2739_v55, %v2738_v51  ;;  %v1068_v57 = vadd.f32 %v1067_v54, %v971_v53  ;;  %2979 = vmatpush3.bf16.msra.mxu0 %v3085_v29 }
 0x146   : > { %v2741_v58 = vpop.f32.mrf.mxu0 }
 0x147   : > { %v976_v60 = vadd.f32 %v2740_v56, %v3549_v17  ;;  %v1092_v1 = vmax.f32 %v1068_v57, 0.0 }
 0x148   : > { %v2742_v61 = vpop.f32.mrf.mxu0 }
 0x149   : > { %v1073_v62 = vadd.f32 %v2946_v30, %v976_v60  ;;  %v2743_v63 = vadd.f32 %v2742_v61, %v2741_v58  ;;  %v1104_v7 = vpack.c.bf16 %v1092_v1, %v1090_v45  ;;  %v3086_v30 = vld [vmem:[%s3870_s5 + $0x98] sm:$0xff]  }
 0x14a   : > { %2980 = vmatprep.subr.bf16.mxu0 %v3086_v30 }
 0x14b   : > { %v1093_v3 = vmax.f32 %v1073_v62, 0.0  ;;  %v979_v4 = vadd.f32 %v2743_v63, %v3549_v17  ;;  %v3068_v17 = vld [vmem:[%s3870_s5 + $0x70] sm:$0xff]   ;;  %2981 = vmatpush3.bf16.msra.mxu0 %v3086_v30 }
 0x14c   : > { %2814 = vmatprep.subr.bf16.mxu1 %v3068_v17  ;;  %2982 = vmatprep.subr.bf16.mxu0 %v3087_v31 }
 0x14d   : > { %v1076_v5 = vadd.f32 %v2947_v47, %v979_v4  ;;  %v1105_v6 = vpack.c.bf16 %v1093_v3, %v1091_v2  ;;  %2815 = vmatpush3.bf16.msra.mxu1 %v3069_v12 }
 0x14e   : > { %2816 = vmatprep.subr.bf16.mxu1 %v3070_v13 }
 0x14f   : > { %v1094_v8 = vmax.f32 %v1076_v5, 0.0  ;;  %1362 = vmatprep.mubr.bf16.mxu1 %v1105_v6  ;;  %2983 = vmatpush3.bf16.msra.mxu0 %v3087_v31 }
 0x150   : > { %1363 = vmatmul.mubr.bf16.gmra.mxu1 %v1104_v7  ;;  %2984 = vmatprep.subr.bf16.mxu0 %v3088_v32 }
 0x151   : > { %v1106_v9 = vpack.c.bf16 %v1094_v8, %v1092_v1  ;;  %2817 = vmatpush3.bf16.msra.mxu1 %v3071_v14 }
 0x152   : > { %2818 = vmatprep.subr.bf16.mxu1 %v3072_v15 }
 0x153   : > { %2969 = vmatmul.mubr.bf16.gmra.mxu0 %v1106_v9 }
 0x154   : > { %2985 = vmatpush3.bf16.msra.mxu0 %v3088_v32 }
 0x155   : > { %2819 = vmatpush3.bf16.msra.mxu1 %v3073_v16  ;;  %2986 = vmatprep.subr.bf16.mxu0 %v3089_v33 }
 0x156   : > { %2820 = vmatprep.subr.bf16.mxu1 %v3074_v18 }
 0x158   : > { %2987 = vmatpush3.bf16.msra.mxu0 %v3089_v33  ;;  %v3090_v33 = vld [vmem:[%s3872_s7 + $0x78] sm:$0xff]  }
 0x159   : > { %2821 = vmatpush3.bf16.msra.mxu1 %v3075_v19 }
 0x15a   : > { %2822 = vmatprep.subr.bf16.mxu1 %v3076_v20 }
 0x15d   : > { %2823 = vmatpush3.bf16.msra.mxu1 %v3077_v21 }
 0x15e   : > { %2824 = vmatprep.subr.bf16.mxu1 %v3078_v22 }
 0x161   : > { %2825 = vmatpush3.bf16.msra.mxu1 %v3079_v23 }
 0x162   : > { %2826 = vmatprep.subr.bf16.mxu1 %v3080_v24 }
 0x165   : > { %2827 = vmatpush3.bf16.msra.mxu1 %v3081_v25 }
 0x166   : > { %2850 = vmatprep.subr.bf16.mxu1 %v3090_v33 }
 0x1e0   : > { %v2776_v34 = vpop.f32.mrf.mxu1 }
 0x1e2   : > { %v2777_v35 = vpop.f32.mrf.mxu1 }
 0x1e3   : > { %v2778_v38 = vadd.f32 %v2777_v35, %v2776_v34  ;;  %v3091_v34 = vld [vmem:[%s3872_s7 + $0x38] sm:$0xff]  }
 0x1e4   : > { %v2779_v36 = vpop.f32.mrf.mxu1  ;;  %v3092_v35 = vld [vmem:[%s3872_s7 + $0xf8] sm:$0xff]  }
 0x1e5   : > { %v1341_v46 = vadd.f32 %v2778_v38, %v2562_v40  ;;  %2872 = vmatprep.subr.bf16.mxu0 %v3092_v35  ;;  %v3096_v38 = vld [vmem:[%s3872_s7 + $0xf0] sm:$0xff]  }
 0x1e6   : > { %v2780_v37 = vpop.f32.mrf.mxu1 }
 0x1e7   : > { %v2781_v44 = vadd.f32 %v2780_v37, %v2779_v36  ;;  %v3093_v36 = vld [vmem:[%s3872_s7 + $0x70] sm:$0xff]   ;;  %v3094_v37 = vld [vmem:[%s3872_s7 + $0xb8] sm:$0xff]  }
 0x1e9   : > { %v1344_v55 = vadd.f32 %v2781_v44, %v2562_v40  ;;  %v3102_v44 = vld [vmem:[%s3872_s7 + $0xa8] sm:$0xff]  }
 0x1f0   : > { %v2782_v39 = vpop.f32.mrf.mxu1 }
 0x1f2   : > { %v2783_v41 = vpop.f32.mrf.mxu1 }
 0x1f3   : > { %v2784_v42 = vadd.f32 %v2783_v41, %v2782_v39  ;;  %v2966_v43 = vpop.f32.mrf.mxu0  ;;  %v3095_v39 = vld [vmem:[%s3872_s7 + $0x30] sm:$0xff]   ;;  %v3097_v41 = vld [vmem:[%s3872_s7 + $0x68] sm:$0xff]  }
 0x1f4   : > { %v2785_v45 = vpop.f32.mrf.mxu1 }
 0x1f5   : > { %v1349_v47 = vadd.f32 %v2784_v42, %v2562_v40  ;;  %v1405_v48 = vpop.f32.mrf.mxu0  ;;  %v3100_v42 = vld [vmem:[%s3872_s7 + $0xe8] sm:$0xff]  }
 0x1f6   : > { %v1406_v49 = vadd.f32 %v1405_v48, %v1341_v46  ;;  %v2786_v50 = vpop.f32.mrf.mxu1  ;;  %v3104_v46 = vld [vmem:[%s3872_s7 + $0xe0] sm:$0xff]  }
 0x1f7   : > { %v1414_v51 = vadd.f32 %v2966_v43, %v1349_v47  ;;  %v2787_v52 = vadd.f32 %v2786_v50, %v2785_v45  ;;  %v2967_v53 = vpop.f32.mrf.mxu0  ;;  %v3099_v43 = vld [vmem:[%s3872_s7 + $0x28] sm:$0xff]   ;;  %v3101_v45 = vld [vmem:[%s3872_s7 + $0x60] sm:$0xff]   ;;  %v3107_v50 = vld [vmem:[%s3872_s7 + $0x18] sm:$0xff]  }
 0x1f8   : > { %v1436_v54 = vmax.f32 %v1406_v49, 0.0  ;;  %v3103_v47 = vld [vmem:[%s3872_s7 + $0x20] sm:$0xff]   ;;  %v3105_v49 = vld [vmem:[%s3872_s7 + $0x58] sm:$0xff]  }
 0x1f9   : > { %v1438_v56 = vmax.f32 %v1414_v51, 0.0  ;;  %v1352_v57 = vadd.f32 %v2787_v52, %v2562_v40  ;;  %v1408_v58 = vpop.f32.mrf.mxu0  ;;  %v3106_v48 = vld [vmem:[%s3872_s7 + $0xa0] sm:$0xff]   ;;  %v3108_v51 = vld [vmem:[%s3872_s7 + $0xd8] sm:$0xff]   ;;  %v3109_v52 = vld [vmem:[%s3872_s7 + $0x50] sm:$0xff]  }
 0x1fa   : > { %v1409_v59 = vadd.f32 %v1408_v58, %v1344_v55  ;;  %v3112_v55 = vld [vmem:[%s3872_s7 + $0xd0] sm:$0xff]   ;;  %v3115_v58 = vld [vmem:[%s3872_s7 + $0x8] sm:$0xff]  }
 0x1fb   : > { %v1445_v60 = vpack.c.bf16 %v1438_v56, %v1436_v54  ;;  %v1417_v61 = vadd.f32 %v2967_v53, %v1352_v57  ;;  %v3110_v53 = vld [vmem:[%s3872_s7 + $0x98] sm:$0xff]   ;;  %v3111_v54 = vld [vmem:[%s3872_s7 + $0x10] sm:$0xff]   ;;  %v3113_v56 = vld [vmem:[%s3872_s7 + $0x48] sm:$0xff]  }
 0x1fc   : > { %v1437_v62 = vmax.f32 %v1409_v59, 0.0  ;;  %v3114_v57 = vld [vmem:[%s3872_s7 + $0x90] sm:$0xff]   ;;  %v3116_v59 = vld [vmem:[%s3872_s7 + $0xc8] sm:$0xff]  }
 0x1fd   : > { %v1439_v63 = vmax.f32 %v1417_v61, 0.0  ;;  %1681 = vmatprep.mubr.bf16.mxu1 %v1445_v60  ;;  %v3117_v60 = vld [vmem:[%s3872_s7 + $0x40] sm:$0xff]   ;;  %v3118_v61 = vld [vmem:[%s3872_s7 + $0x88] sm:$0xff]  }
 0x1fe   : > { %v1444_v1 = vpack.c.bf16 %v1437_v62, %v3190_v0 }
 0x1ff   : > { %v1446_v2 = vpack.c.bf16 %v1439_v63, %v1437_v62  ;;  %v3119_v62 = vld [vmem:[%s3872_s7] sm:$0xff]  }
 0x200   : > { %1682 = vmatmul.mubr.bf16.vlgmr.msra.gmra.mxu1 %v1444_v1  ;;  %v2788_v3 = vpop.f32.mrf.mxu1  ;;  %v3121_v1 = vld [vmem:[%s3872_s7 + $0x80] sm:$0xff]  }
 0x201   : > { %2988 = vmatprep.mubr.bf16.mxu0 %v1446_v2  ;;  %2851 = vmatpush3.bf16.msra.mxu1 %v3091_v34  ;;  %v3124_v2 = vld [vmem:[%s3874_s9 + $0x74] ss:$8 sps:$4 sm:$0xff]   ;;  %v3127_v34 = vld [vmem:[%s3874_s9 + $0x64] ss:$8 sps:$4 sm:$0xff]  }
 0x202   : > { %v2789_v4 = vpop.f32.mrf.mxu1  ;;  %2852 = vmatprep.subr.bf16.mxu1 %v3093_v36 }
 0x203   : > { %v2790_v7 = vadd.f32 %v2789_v4, %v2788_v3 }
 0x204   : > { %v2791_v5 = vpop.f32.mrf.mxu1 }
 0x205   : > { %v1357_v13 = vadd.f32 %v2790_v7, %v2562_v40  ;;  %2853 = vmatpush3.bf16.msra.mxu1 %v3095_v39  ;;  %v3128_v39 = vld [vmem:[%s3874_s9 + $0x50] ss:$8 sps:$4 sm:$0xff]  }
 0x206   : > { %v2792_v6 = vpop.f32.mrf.mxu1  ;;  %2854 = vmatprep.subr.bf16.mxu1 %v3097_v41  ;;  %v3131_v41 = vld [vmem:[%s3874_s9 + $0x40] ss:$8 sps:$4 sm:$0xff]  }
 0x207   : > { %v2793_v17 = vadd.f32 %v2792_v6, %v2791_v5 }
 0x209   : > { %v1360_v22 = vadd.f32 %v2793_v17, %v2562_v40  ;;  %2855 = vmatpush3.bf16.msra.mxu1 %v3099_v43  ;;  %v3134_v43 = vld [vmem:[%s3874_s9 + $0x30] ss:$8 sps:$4 sm:$0xff]  }
 0x20a   : > { %2856 = vmatprep.subr.bf16.mxu1 %v3101_v45  ;;  %v3137_v45 = vld [vmem:[%s3874_s9 + $0x20] ss:$8 sps:$4 sm:$0xff]  }
 0x20d   : > { %2857 = vmatpush3.bf16.msra.mxu1 %v3103_v47  ;;  %v3140_v47 = vld [vmem:[%s3874_s9 + $0x10] ss:$8 sps:$4 sm:$0xff]  }
 0x20e   : > { %2858 = vmatprep.subr.bf16.mxu1 %v3105_v49  ;;  %v3143_v49 = vld [vmem:[%s3874_s9] ss:$8 sps:$4 sm:$0xff]  }
 0x210   : > { %v2794_v8 = vpop.f32.mrf.mxu1 }
 0x211   : > { %2859 = vmatpush3.bf16.msra.mxu1 %v3107_v50  ;;  %v3191_v50 = vmov 0  }
 0x212   : > { %v2795_v9 = vpop.f32.mrf.mxu1  ;;  %2860 = vmatprep.subr.bf16.mxu1 %v3109_v52  ;;  %v3147_v52 = vld [vmem:[%s3876_s11 + $0x38] sm:$0xff]  }
 0x213   : > { %v2796_v10 = vadd.f32 %v2795_v9, %v2794_v8  ;;  %v2970_v11 = vpop.f32.mrf.mxu0  ;;  %v2587_v9 = vld [vmem:[%s3871_s6] ss:$0 sm:$0xff] }
 0x214   : > { %v2797_v12 = vpop.f32.mrf.mxu1 }
 0x215   : > { %v1365_v14 = vadd.f32 %v2796_v10, %v2562_v40  ;;  %v1421_v15 = vpop.f32.mrf.mxu0  ;;  %2861 = vmatpush3.bf16.msra.mxu1 %v3111_v54  ;;  %v3149_v54 = vld [vmem:[%s3876_s11 + $0x30] sm:$0xff]  }
 0x216   : > { %v1422_v16 = vadd.f32 %v1421_v15, %v1357_v13  ;;  %v2798_v18 = vpop.f32.mrf.mxu1  ;;  %2862 = vmatprep.subr.bf16.mxu1 %v3113_v56  ;;  %v3151_v56 = vld [vmem:[%s3876_s11 + $0x28] sm:$0xff]  }
 0x217   : > { %v1430_v0 = vadd.f32 %v2970_v11, %v1365_v14  ;;  %v2799_v19 = vadd.f32 %v2798_v18, %v2797_v12  ;;  %v2971_v20 = vpop.f32.mrf.mxu0 }
 0x218   : > { %v1440_v21 = vmax.f32 %v1422_v16, 0.0 }
 0x219   : > { %v1442_v23 = vmax.f32 %v1430_v0, 0.0  ;;  %v1368_v24 = vadd.f32 %v2799_v19, %v2562_v40  ;;  %v1424_v25 = vpop.f32.mrf.mxu0  ;;  %v3098_v40 = vld [vmem:[%s3872_s7 + $0xb0] sm:$0xff]   ;;  %2863 = vmatpush3.bf16.msra.mxu1 %v3115_v58  ;;  %v3153_v58 = vld [vmem:[%s3876_s11 + $0x20] sm:$0xff]  }
 0x21a   : > { %v1425_v26 = vadd.f32 %v1424_v25, %v1360_v22  ;;  %2864 = vmatprep.subr.bf16.mxu1 %v3117_v60  ;;  %v3155_v60 = vld [vmem:[%s3876_s11 + $0x18] sm:$0xff]  }
 0x21b   : > { %v1448_v27 = vpack.c.bf16 %v1442_v23, %v1440_v21  ;;  %v1433_v28 = vadd.f32 %v2971_v20, %v1368_v24 }
 0x21c   : > { %v1441_v29 = vmax.f32 %v1425_v26, 0.0 }
 0x21d   : > { %v1443_v30 = vmax.f32 %v1433_v28, 0.0  ;;  %1689 = vmatprep.mubr.bf16.mxu1 %v1448_v27  ;;  %2865 = vmatpush3.bf16.msra.mxu1 %v3119_v62  ;;  %v3157_v62 = vld [vmem:[%s3876_s11 + $0x10] sm:$0xff]  }
 0x21e   : > { %v1447_v31 = vpack.c.bf16 %v1441_v29, %v1439_v63  ;;  %v3120_v63 = vld [vmem:[%s3872_s7 + $0xc0] sm:$0xff]   ;;  %2208 = vmatprep.subr.bf16.mxu1 %v3124_v2 }
 0x21f   : > { %v1449_v32 = vpack.c.bf16 %v1443_v30, %v1441_v29 }
 0x220   : > { %1690 = vmatmul.mubr.bf16.gmra.mxu1 %v1447_v31  ;;  %v3122_v31 = vld [vmem:[%s3874_s9 + $0x70] ss:$8 sps:$4 sm:$0xff]  }
 0x221   : > { %2989 = vmatmul.mubr.bf16.vlgmr.msra.gmra.mxu0 %v1449_v32 }
 0x222   : > { %2873 = vmatpush3.bf16.msra.mxu0 %v3094_v37  ;;  %v3125_v37 = vld [vmem:[%s3874_s9 + $0x60] ss:$8 sps:$4 sm:$0xff]  }
 0x223   : > { %2874 = vmatprep.subr.bf16.mxu0 %v3096_v38  ;;  %v3130_v38 = vld [vmem:[%s3874_s9 + $0x54] ss:$8 sps:$4 sm:$0xff]  }
 0x226   : > { %2875 = vmatpush3.bf16.msra.mxu0 %v3098_v40  ;;  %v3133_v40 = vld [vmem:[%s3874_s9 + $0x44] ss:$8 sps:$4 sm:$0xff]  }
 0x227   : > { %2876 = vmatprep.subr.bf16.mxu0 %v3100_v42  ;;  %v3136_v42 = vld [vmem:[%s3874_s9 + $0x34] ss:$8 sps:$4 sm:$0xff]  }
 0x22a   : > { %2877 = vmatpush3.bf16.msra.mxu0 %v3102_v44  ;;  %v3139_v44 = vld [vmem:[%s3874_s9 + $0x24] ss:$8 sps:$4 sm:$0xff]  }
 0x22b   : > { %2878 = vmatprep.subr.bf16.mxu0 %v3104_v46  ;;  %v3142_v46 = vld [vmem:[%s3874_s9 + $0x14] ss:$8 sps:$4 sm:$0xff]  }
 0x22e   : > { %2879 = vmatpush3.bf16.msra.mxu0 %v3106_v48  ;;  %v3145_v48 = vld [vmem:[%s3874_s9 + $0x4] ss:$8 sps:$4 sm:$0xff]  }
 0x22f   : > { %2880 = vmatprep.subr.bf16.mxu0 %v3108_v51  ;;  %v3146_v51 = vld [vmem:[%s3876_s11 + $0x78] sm:$0xff]  }
 0x232   : > { %2881 = vmatpush3.bf16.msra.mxu0 %v3110_v53  ;;  %v3148_v53 = vld [vmem:[%s3876_s11 + $0x70] sm:$0xff]  }
 0x233   : > { %2882 = vmatprep.subr.bf16.mxu0 %v3112_v55  ;;  %v3150_v55 = vld [vmem:[%s3876_s11 + $0x68] sm:$0xff]  }
 0x236   : > { %2883 = vmatpush3.bf16.msra.mxu0 %v3114_v57  ;;  %v3152_v57 = vld [vmem:[%s3876_s11 + $0x60] sm:$0xff]  }
 0x237   : > { %2884 = vmatprep.subr.bf16.mxu0 %v3116_v59  ;;  %v3154_v59 = vld [vmem:[%s3876_s11 + $0x58] sm:$0xff]  }
 0x23a   : > { %2885 = vmatpush3.bf16.msra.mxu0 %v3118_v61  ;;  %v3156_v61 = vld [vmem:[%s3876_s11 + $0x50] sm:$0xff]  }
 0x23b   : > { %2886 = vmatprep.subr.bf16.mxu0 %v3120_v63 }
 0x23e   : > { %2887 = vmatpush3.bf16.msra.mxu0 %v3121_v1  ;;  %v2612_v1 = vld [vmem:[%s3873_s8] ss:$0 sm:$0xff] }
 0x23f   : > { %2894 = vmatprep.subr.bf16.mxu0 %v3146_v51 }
 0x2c0   : > { %v2828_v3 = vpop.f32.mrf.mxu1 }
 0x2c2   : > { %v2829_v4 = vpop.f32.mrf.mxu1 }
 0x2c3   : > { %v2830_v7 = vadd.f32 %v2829_v4, %v2828_v3 }
 0x2c4   : > { %v2831_v5 = vpop.f32.mrf.mxu1 }
 0x2c5   : > { %v1684_v13 = vadd.f32 %v2830_v7, %v2587_v9 }
 0x2c6   : > { %v2832_v6 = vpop.f32.mrf.mxu1 }
 0x2c7   : > { %v2833_v11 = vadd.f32 %v2832_v6, %v2831_v5 }
 0x2c9   : > { %v1687_v20 = vadd.f32 %v2833_v11, %v2587_v9 }
 0x2e0   : > { %v2834_v8 = vpop.f32.mrf.mxu1 }
 0x2e1   : > { %v2990_v10 = vpop.f32.mrf.mxu0 }
 0x2e2   : > { %v2835_v17 = vpop.f32.mrf.mxu1 }
 0x2e3   : > { %v2836_v12 = vadd.f32 %v2835_v17, %v2834_v8  ;;  %v1732_v14 = vpop.f32.mrf.mxu0 }
 0x2e4   : > { %v2837_v15 = vpop.f32.mrf.mxu1  ;;  %v1733_v18 = vadd.f32 %v1732_v14, %v1684_v13  ;;  %v3158_v14 = vld [vmem:[%s3876_s11 + $0x48] sm:$0xff]  }
 0x2e5   : > { %v1692_v16 = vadd.f32 %v2836_v12, %v2587_v9  ;;  %v2991_v0 = vpop.f32.mrf.mxu0 }
 0x2e6   : > { %v2838_v19 = vpop.f32.mrf.mxu1  ;;  %v1747_v25 = vmax.f32 %v1733_v18, 0.0  ;;  %v3161_v18 = vld [vmem:[%s3876_s11] sm:$0xff]  }
 0x2e7   : > { %v2839_v21 = vadd.f32 %v2838_v19, %v2837_v15  ;;  %v1735_v22 = vpop.f32.mrf.mxu0  ;;  %v1741_v23 = vadd.f32 %v2990_v10, %v1692_v16  ;;  %v3159_v15 = vld [vmem:[%s3876_s11 + $0x8] sm:$0xff]   ;;  %v3160_v16 = vld [vmem:[%s3876_s11 + $0x40] sm:$0xff]  }
 0x2e8   : > { %v1736_v24 = vadd.f32 %v1735_v22, %v1687_v20  ;;  %v1751_v32 = vpack.c.bf16 %v1747_v25, %v1747_v25 }
 0x2e9   : > { %v1695_v26 = vadd.f32 %v2839_v21, %v2587_v9  ;;  %v1749_v29 = vmax.f32 %v1741_v23, 0.0  ;;  %v2116_v21 = vld [vmem:[%s3875_s10] sm:$0x3] }
 0x2ea   : > { %v1748_v27 = vmax.f32 %v1736_v24, 0.0 }
 0x2eb   : > { %v1744_v28 = vadd.f32 %v2991_v0, %v1695_v26  ;;  %v1753_v36 = vpack.c.bf16 %v1749_v29, %v1749_v29  ;;  %v2118_v0 = vlaneseq }
 0x2ec   : > { %v1752_v30 = vpack.c.bf16 %v1748_v27, %v1748_v27 }
 0x2ed   : > { %v1750_v33 = vmax.f32 %v1744_v28, 0.0  ;;  %v2119_v19 = vshrl.u32 %v2118_v0, 7 }
 0x2ee   : > { %2050 = vmatprep.mubr.bf16.mxu1 %v1752_v30 }
 0x2ef   : > { %2051 = vmatmul.mubr.bf16.vlgmr.msra.gmra.mxu1 %v1751_v32  ;;  %v1754_v35 = vpack.c.bf16 %v1750_v33, %v1750_v33  ;;  %v2120_v20 = vsub.s32 0, %v2119_v19  ;;  %v2124_v22 = vsub.s32 1, %v2119_v19 }
 0x2f0   : > { %2209 = vmatpush1.bf16.msra.mxu1 %v3122_v31  ;;  %2240 = vmatprep.mubr.bf16.mxu1 %v3191_v50 }
 0x2f1   : > { %2090 = vmatprep.mubr.bf16.mxu0 %v1754_v35  ;;  %2210 = vmatprep.subr.bf16.mxu1 %v3127_v34  ;;  %v2121_v23 = vrot.slane %v2116_v21, %v2120_v20  ;;  %v2125_v24 = vrot.slane %v2116_v21, %v2124_v22 }
 0x2f2   : > { %2091 = vmatmul.mubr.bf16.vlgmr.msra.gmra.mxu0 %v1753_v36 }
 0x2f3   : > { %2895 = vmatpush3.bf16.msra.mxu0 %v3147_v52 }
 0x2f4   : > { %2211 = vmatpush1.bf16.msra.mxu1 %v3125_v37  ;;  %2896 = vmatprep.subr.bf16.mxu0 %v3148_v53  ;;  %v2661_v37 = vld [vmem:[%s3877_s12] ss:$0 sm:$0xff] }
 0x2f5   : > { %2212 = vmatprep.subr.bf16.mxu1 %v3130_v38 }
 0x2f7   : > { %2897 = vmatpush3.bf16.msra.mxu0 %v3149_v54 }
 0x2f8   : > { %2213 = vmatpush1.bf16.msra.mxu1 %v3128_v39  ;;  %2898 = vmatprep.subr.bf16.mxu0 %v3150_v55 }
 0x2f9   : > { %2214 = vmatprep.subr.bf16.mxu1 %v3133_v40 }
 0x2fb   : > { %2899 = vmatpush3.bf16.msra.mxu0 %v3151_v56 }
 0x2fc   : > { %2215 = vmatpush1.bf16.msra.mxu1 %v3131_v41  ;;  %2900 = vmatprep.subr.bf16.mxu0 %v3152_v57 }
 0x2fd   : > { %2216 = vmatprep.subr.bf16.mxu1 %v3136_v42 }
 0x2ff   : > { %2901 = vmatpush3.bf16.msra.mxu0 %v3153_v58 }
 0x300   : > { %2217 = vmatpush1.bf16.msra.mxu1 %v3134_v43  ;;  %2902 = vmatprep.subr.bf16.mxu0 %v3154_v59 }
 0x301   : > { %2218 = vmatprep.subr.bf16.mxu1 %v3139_v44 }
 0x303   : > { %2903 = vmatpush3.bf16.msra.mxu0 %v3155_v60 }
 0x304   : > { %2219 = vmatpush1.bf16.msra.mxu1 %v3137_v45  ;;  %2904 = vmatprep.subr.bf16.mxu0 %v3156_v61 }
 0x305   : > { %2220 = vmatprep.subr.bf16.mxu1 %v3142_v46 }
 0x307   : > { %2905 = vmatpush3.bf16.msra.mxu0 %v3157_v62 }
 0x308   : > { %2221 = vmatpush1.bf16.msra.mxu1 %v3140_v47  ;;  %2906 = vmatprep.subr.bf16.mxu0 %v3158_v14 }
 0x309   : > { %2222 = vmatprep.subr.bf16.mxu1 %v3145_v48 }
 0x30b   : > { %2907 = vmatpush3.bf16.msra.mxu0 %v3159_v15 }
 0x30c   : > { %2223 = vmatpush1.bf16.msra.mxu1 %v3143_v49  ;;  %2908 = vmatprep.subr.bf16.mxu0 %v3160_v16 }
 0x30f   : > { %2909 = vmatpush3.bf16.msra.mxu0 %v3161_v18 }
 0x3af   : > { %v2866_v63 = vpop.f32.mrf.mxu1 }
 0x3b1   : > { %v2867_v2 = vpop.f32.mrf.mxu1 }
 0x3b2   : > { %v2868_v3 = vadd.f32 %v2867_v2, %v2866_v63  ;;  %v2888_v4 = vpop.f32.mrf.mxu0 }
 0x3b3   : > { %v2869_v5 = vpop.f32.mrf.mxu1 }
 0x3b4   : > { %v2053_v6 = vadd.f32 %v2868_v3, %v2612_v1  ;;  %v2889_v7 = vpop.f32.mrf.mxu0 }
 0x3b5   : > { %v2890_v8 = vadd.f32 %v2889_v7, %v2888_v4  ;;  %v2870_v9 = vpop.f32.mrf.mxu1 }
 0x3b6   : > { %v2891_v10 = vpop.f32.mrf.mxu0 }
 0x3b7   : > { %v2093_v11 = vadd.f32 %v2890_v8, %v2053_v6 }
 0x3b8   : > { %v2892_v17 = vpop.f32.mrf.mxu0 }
 0x3b9   : > { %v2098_v12 = vmax.f32 %v2093_v11, 0.0 }
 0x3bb   : > { %v2099_v13 = vpack.c.bf16 %v2098_v12, %v2098_v12 }
 0x3bd   : > { %2241 = vmatmul.mubr.bf16.vlgmr.msra.gmra.mxu1 %v2099_v13 }
 0x47d   : > { %v2242_v25 = vpop.f32.mrf.mxu1 }
 0x47e   : > { %v2243_v26 = vadd.f32 %v2242_v25, %v2121_v23 }
 0x47f   : > { %v2244_v27 = vpop.f32.mrf.mxu1 }
 0x480   : > { %v2245_v28 = vadd.f32 %v2244_v27, %v2125_v24  ;;  %v2249_v29 = vmax.f32 %v2243_v26, 0.0 }
 0x481   : > { %v2246_v30 = vpop.f32.mrf.mxu1 }
 0x482   : > { %v2250_v31 = vmax.f32 %v2245_v28, 0.0  ;;  %v2251_v34 = vpack.c.bf16 %v2249_v29, %v2249_v29 }
 0x483   : > { %v2247_v32 = vpop.f32.mrf.mxu1 }
 0x484   : > { %v2252_v33 = vpack.c.bf16 %v2250_v31, %v2250_v31 }
 0x486   : > { %2420 = vmatprep.mubr.bf16.mxu0 %v2252_v33 }
 0x487   : > { %2421 = vmatmul.mubr.bf16.vlgmr.msra.gmra.mxu0 %v2251_v34 }
 0x547   : > { %v2910_v35 = vpop.f32.mrf.mxu0 }
 0x549   : > { %v2911_v36 = vpop.f32.mrf.mxu0 }
 0x54a   : > { %v2912_v38 = vadd.f32 %v2911_v36, %v2910_v35 }
 0x54b   : > { %v2913_v39 = vpop.f32.mrf.mxu0 }
 0x54c   : > { %v2423_v40 = vadd.f32 %v2912_v38, %v2661_v37 }
 0x54d   : > { %v2914_v41 = vpop.f32.mrf.mxu0 }
 0x54e   : > { %2428 = vmax.xlane.f32.xlu0 %v2423_v40 }
 0x5d7   : > { %v2429_v42 = vpop.xlane.xlu0 %2428 }
 0x5d8   : > { %v2430_v43 = vsub.f32 %v2423_v40, %v2429_v42 }
 0x5da   : > { %v2431_v44 = vmul.f32 1.442695, %v2430_v43 }
 0x5dc   : > { %3162 = vpow2.f32 %v2431_v44 }
 0x5e9   : > { %v3163_v45 = vpop.eup %3162 }
 0x5ea   : > { %2433 = vadd.xlane.f32.xlu0 %v3163_v45 }
 0x673   : > { %v2434_v46 = vpop.xlane.xlu0 %2433 }
 0x674   : > { %3164 = vrcp.f32 %v2434_v46 }
 0x681   : > { %v3165_v47 = vpop.eup %3164 }
 0x682   : > { %v2436_v48 = vmul.f32 %v3165_v47, %v3163_v45 }
 0x684   : > { %2437 = vst [vmem:[%s597_s17] sm:$0xff] %v2436_v48 }
 0x685 PF: > { %p20_p9 = scmp.ge.s32.totalorder %s3279_s29, 4   ;;  %s3879_s25 = smov %s3184_s26 }
 0x686   : > { %s3880_s26 = smov %s3288_s15  ;;  %s3881_s27 = smov %s3279_s29 }
 0x687   :  { %22 = sbr.rel (!%p20_p9) target bundleno = 2 (0x2), region = 176 }

</bundles_post_ra>
